<compile_context>
chip_gen: v7x
topology: tpu7x:2x2x1
jax: 0.10.0
libtpu: 0.0.40
codegen_flags: <defaults>
</compile_context>

<pallas_src>
import jax
import jax.numpy as jnp
from jax.experimental import pallas as pl
from jax.experimental.pallas import tpu as pltpu


def _round_up(x: int, m: int) -> int:
    return ((x + m - 1) // m) * m


def pad_latent_table(Z: jax.Array) -> jax.Array:
    """One-time (init-time) lane padding of the latent table to a multiple of
    128 columns.  Do this once when the Parameter is created, NOT per forward
    call -- per-call padding costs a full N x z_dim HBM read+write."""
    _, z_dim = Z.shape
    z_pad = _round_up(z_dim, 128)
    if z_pad != z_dim:
        Z = jnp.pad(Z, ((0, 0), (0, z_pad - z_dim)))
    return Z


# --------------------------------------------------------------------------
# Kernel body
# --------------------------------------------------------------------------
def _gather_rows_kernel(idx_ref, z_hbm, out_ref, sem):
    """Gather `rows` table rows straight from HBM into the pipelined output
    block for this grid step."""
    rows = out_ref.shape[0]
    base = pl.program_id(0) * rows

    # Issue phase: read every index (SMEM scalar loads) and start every row
    # DMA before any wait, so all row DMAs overlap each other and the scalar
    # pipe is never stalled behind a .wait().
    copies = []
    for r in range(rows):                      # small static trip count
        idx = idx_ref[base + r]                # scalar read from SMEM
        cp = pltpu.make_async_copy(z_hbm.at[idx], out_ref.at[r], sem.at[r])
        cp.start()
        copies.append(cp)

    # Wait phase: wait on the exact descriptors that were started.
    for cp in copies:
        cp.wait()
    # Data already sits in out_ref; the Pallas output pipeline writes this
    # block back to HBM while the next grid step issues its gather DMAs.


# --------------------------------------------------------------------------
# Wrapper
# --------------------------------------------------------------------------
def latent_lookup(Z: jax.Array, indices: jax.Array,
                  z_dim: int | None = None,
                  rows_per_step: int | None = None) -> jax.Array:
    """Pallas equivalent of LatentVariables.forward: returns Z[indices].

    `Z` should already be lane-padded via pad_latent_table(); if not, it is
    padded here as a (slow) fallback.  `z_dim` selects how many of Z's
    columns are real latent dimensions (defaults to Z.shape[1])."""
    assert Z.ndim == 2 and indices.ndim == 1
    N, z_cols = Z.shape
    B = indices.shape[0]
    indices = indices.astype(jnp.int32)
    if z_dim is None:
        z_dim = z_cols
    z_dim = min(z_dim, z_cols)

    # Lane-dense last dim (fallback pad; prefer pad_latent_table at init).
    z_pad = _round_up(z_cols, 128)
    Z_p = jnp.pad(Z, ((0, 0), (0, z_pad - z_cols))) if z_pad != z_cols else Z

    itemsize = jnp.dtype(Z.dtype).itemsize
    # dtype-aware sublane floor: (8,128) f32, (16,128) bf16, (32,128) int8.
    floor = max(8, 32 // itemsize)
    if rows_per_step is None:
        # Cap keeps the unrolled DMA issue/wait loops and the per-step DMA
        # semaphore count modest while amortizing the ~0.35 us grid-step
        # overhead to <10 ns/row.
        rows_per_step = min(64, max(floor, _round_up(B, floor)))
    rows_per_step = _round_up(rows_per_step, floor)

    B_pad = _round_up(B, rows_per_step)
    idx_p = jnp.pad(indices, (0, B_pad - B)) if B_pad != B else indices
    n_blocks = B_pad // rows_per_step

    # Precise VMEM claim: Z never enters VMEM (memory_space=pl.ANY), indices
    # live in SMEM; only the double-buffered output block uses VMEM.
    out_tile_bytes = rows_per_step * z_pad * itemsize
    vmem_limit = max(2 * out_tile_bytes + (2 << 20), 8 << 20)

    grid_spec = pltpu.PrefetchScalarGridSpec(
        num_scalar_prefetch=1,                          # indices -> SMEM
        grid=(n_blocks,),
        in_specs=[pl.BlockSpec(memory_space=pl.ANY)],   # Z stays in HBM
        out_specs=pl.BlockSpec((rows_per_step, z_pad),
                               lambda i, idx: (i, 0)),
        scratch_shapes=[pltpu.SemaphoreType.DMA((rows_per_step,))],
    )

    out = pl.pallas_call(
        _gather_rows_kernel,
        grid_spec=grid_spec,
        out_shape=jax.ShapeDtypeStruct((B_pad, z_pad), Z.dtype),
        compiler_params=pltpu.CompilerParams(
            # Each output block is written once by a distinct grid index, so
            # the axis is safely parallel (lets v7x shard across its 2 TCs).
            dimension_semantics=("parallel",),
            vmem_limit_bytes=vmem_limit,
        ),
    )(idx_p, Z_p)

    return out[:B, :z_dim]


# --------------------------------------------------------------------------
# Demo / correctness check
# --------------------------------------------------------------------------
if __name__ == "__main__":
    # Deterministic synthetic stand-in for the PCA-initialized table.
    N = 64        # dataset size (number of latent vectors)
    Z_DIM = 100   # module default z_dim=100 (non-lane-aligned; padded once)
    B = 10        # batch of indices per forward call

    key = jax.random.PRNGKey(0)
    k_z, k_idx = jax.random.split(key)
    Z = jax.random.normal(k_z, (N, Z_DIM), dtype=jnp.float32)
    indices = jax.random.randint(k_idx, (B,), 0, N, dtype=jnp.int32)

    # One-time, init-time lane padding (hoisted out of the per-call path).
    Z_padded = pad_latent_table(Z)

    out = latent_lookup(Z_padded, indices, z_dim=Z_DIM)
    out = jax.block_until_ready(out)

    # Correctness check against plain-JAX reference gather (exact).
    ref = Z[indices]
    assert out.shape == (B, Z_DIM)
    assert jnp.array_equal(out, ref), "Pallas gather mismatch vs reference"

    print("KERNEL_OK")
</pallas_src>

<mosaic_0001>
module attributes {stable_mosaic.version = 11 : i64} {
  func.func @_gather_rows_kernel(%arg0: i32, %arg1: memref<16xi32, #tpu.memory_space<smem>>, %arg2: memref<64x128xf32, #tpu.memory_space<any>>, %arg3: memref<16x128xf32, #tpu.memory_space<vmem>>, %arg4: memref<16x!tpu.dma_semaphore, #tpu.memory_space<semaphore_mem>>) attributes {dimension_semantics = [#tpu.dimension_semantics<parallel>], iteration_bounds = array<i64: 1>, scalar_prefetch = 1 : i64, scratch_operands = 1 : i64, tpu.core_type = #tpu.core_type<tc>, window_params = [{}, {transform_indices = @transform_1, window_bounds = array<i64: 16, 128>}]} {
    %c16_i32 = arith.constant 16 : i32
    %0 = arith.muli %arg0, %c16_i32 : i32
    %c0_i32 = arith.constant 0 : i32
    %1 = arith.addi %0, %c0_i32 : i32
    %2 = arith.index_cast %1 : i32 to index
    %3 = memref.load %arg1[%2] : memref<16xi32, #tpu.memory_space<smem>>
    %c0_i32_0 = arith.constant 0 : i32
    %c0_i32_1 = arith.constant 0 : i32
    %c0_i32_2 = arith.constant 0 : i32
    %4 = tpu.memref_slice %arg2[%3, %c0_i32_2] : memref<64x128xf32, #tpu.memory_space<any>> -> memref<1x128xf32, #tpu.memory_space<any>>
    %5 = tpu.memref_squeeze %4 : memref<1x128xf32, #tpu.memory_space<any>> -> memref<128xf32, #tpu.memory_space<any>>
    %c0_i32_3 = arith.constant 0 : i32
    %6 = tpu.memref_slice %arg3[%c0_i32_0, %c0_i32_3] : memref<16x128xf32, #tpu.memory_space<vmem>> -> memref<1x128xf32, #tpu.memory_space<vmem>>
    %7 = tpu.memref_squeeze %6 : memref<1x128xf32, #tpu.memory_space<vmem>> -> memref<128xf32, #tpu.memory_space<vmem>>
    %8 = tpu.memref_slice %arg4[%c0_i32_1] : memref<16x!tpu.dma_semaphore, #tpu.memory_space<semaphore_mem>> -> memref<1x!tpu.dma_semaphore, #tpu.memory_space<semaphore_mem>>
    %9 = tpu.memref_squeeze %8 : memref<1x!tpu.dma_semaphore, #tpu.memory_space<semaphore_mem>> -> memref<!tpu.dma_semaphore, #tpu.memory_space<semaphore_mem>>
    tpu.enqueue_dma source(%5 : memref<128xf32, #tpu.memory_space<any>>) target(%7 : memref<128xf32, #tpu.memory_space<vmem>>) target_semaphore(%9 : memref<!tpu.dma_semaphore, #tpu.memory_space<semaphore_mem>>)
    %c1_i32 = arith.constant 1 : i32
    %10 = arith.addi %0, %c1_i32 : i32
    %11 = arith.index_cast %10 : i32 to index
    %12 = memref.load %arg1[%11] : memref<16xi32, #tpu.memory_space<smem>>
    %c1_i32_4 = arith.constant 1 : i32
    %c1_i32_5 = arith.constant 1 : i32
    %c0_i32_6 = arith.constant 0 : i32
    %13 = tpu.memref_slice %arg2[%12, %c0_i32_6] : memref<64x128xf32, #tpu.memory_space<any>> -> memref<1x128xf32, #tpu.memory_space<any>>
    %14 = tpu.memref_squeeze %13 : memref<1x128xf32, #tpu.memory_space<any>> -> memref<128xf32, #tpu.memory_space<any>>
    %c0_i32_7 = arith.constant 0 : i32
    %15 = tpu.memref_slice %arg3[%c1_i32_4, %c0_i32_7] : memref<16x128xf32, #tpu.memory_space<vmem>> -> memref<1x128xf32, #tpu.memory_space<vmem>>
    %16 = tpu.memref_squeeze %15 : memref<1x128xf32, #tpu.memory_space<vmem>> -> memref<128xf32, #tpu.memory_space<vmem>>
    %17 = tpu.memref_slice %arg4[%c1_i32_5] : memref<16x!tpu.dma_semaphore, #tpu.memory_space<semaphore_mem>> -> memref<1x!tpu.dma_semaphore, #tpu.memory_space<semaphore_mem>>
    %18 = tpu.memref_squeeze %17 : memref<1x!tpu.dma_semaphore, #tpu.memory_space<semaphore_mem>> -> memref<!tpu.dma_semaphore, #tpu.memory_space<semaphore_mem>>
    tpu.enqueue_dma source(%14 : memref<128xf32, #tpu.memory_space<any>>) target(%16 : memref<128xf32, #tpu.memory_space<vmem>>) target_semaphore(%18 : memref<!tpu.dma_semaphore, #tpu.memory_space<semaphore_mem>>)
    %c2_i32 = arith.constant 2 : i32
    %19 = arith.addi %0, %c2_i32 : i32
    %20 = arith.index_cast %19 : i32 to index
    %21 = memref.load %arg1[%20] : memref<16xi32, #tpu.memory_space<smem>>
    %c2_i32_8 = arith.constant 2 : i32
    %c2_i32_9 = arith.constant 2 : i32
    %c0_i32_10 = arith.constant 0 : i32
    %22 = tpu.memref_slice %arg2[%21, %c0_i32_10] : memref<64x128xf32, #tpu.memory_space<any>> -> memref<1x128xf32, #tpu.memory_space<any>>
    %23 = tpu.memref_squeeze %22 : memref<1x128xf32, #tpu.memory_space<any>> -> memref<128xf32, #tpu.memory_space<any>>
    %c0_i32_11 = arith.constant 0 : i32
    %24 = tpu.memref_slice %arg3[%c2_i32_8, %c0_i32_11] : memref<16x128xf32, #tpu.memory_space<vmem>> -> memref<1x128xf32, #tpu.memory_space<vmem>>
    %25 = tpu.memref_squeeze %24 : memref<1x128xf32, #tpu.memory_space<vmem>> -> memref<128xf32, #tpu.memory_space<vmem>>
    %26 = tpu.memref_slice %arg4[%c2_i32_9] : memref<16x!tpu.dma_semaphore, #tpu.memory_space<semaphore_mem>> -> memref<1x!tpu.dma_semaphore, #tpu.memory_space<semaphore_mem>>
    %27 = tpu.memref_squeeze %26 : memref<1x!tpu.dma_semaphore, #tpu.memory_space<semaphore_mem>> -> memref<!tpu.dma_semaphore, #tpu.memory_space<semaphore_mem>>
    tpu.enqueue_dma source(%23 : memref<128xf32, #tpu.memory_space<any>>) target(%25 : memref<128xf32, #tpu.memory_space<vmem>>) target_semaphore(%27 : memref<!tpu.dma_semaphore, #tpu.memory_space<semaphore_mem>>)
    %c3_i32 = arith.constant 3 : i32
    %28 = arith.addi %0, %c3_i32 : i32
    %29 = arith.index_cast %28 : i32 to index
    %30 = memref.load %arg1[%29] : memref<16xi32, #tpu.memory_space<smem>>
    %c3_i32_12 = arith.constant 3 : i32
    %c3_i32_13 = arith.constant 3 : i32
    %c0_i32_14 = arith.constant 0 : i32
    %31 = tpu.memref_slice %arg2[%30, %c0_i32_14] : memref<64x128xf32, #tpu.memory_space<any>> -> memref<1x128xf32, #tpu.memory_space<any>>
    %32 = tpu.memref_squeeze %31 : memref<1x128xf32, #tpu.memory_space<any>> -> memref<128xf32, #tpu.memory_space<any>>
    %c0_i32_15 = arith.constant 0 : i32
    %33 = tpu.memref_slice %arg3[%c3_i32_12, %c0_i32_15] : memref<16x128xf32, #tpu.memory_space<vmem>> -> memref<1x128xf32, #tpu.memory_space<vmem>>
    %34 = tpu.memref_squeeze %33 : memref<1x128xf32, #tpu.memory_space<vmem>> -> memref<128xf32, #tpu.memory_space<vmem>>
    %35 = tpu.memref_slice %arg4[%c3_i32_13] : memref<16x!tpu.dma_semaphore, #tpu.memory_space<semaphore_mem>> -> memref<1x!tpu.dma_semaphore, #tpu.memory_space<semaphore_mem>>
    %36 = tpu.memref_squeeze %35 : memref<1x!tpu.dma_semaphore, #tpu.memory_space<semaphore_mem>> -> memref<!tpu.dma_semaphore, #tpu.memory_space<semaphore_mem>>
    tpu.enqueue_dma source(%32 : memref<128xf32, #tpu.memory_space<any>>) target(%34 : memref<128xf32, #tpu.memory_space<vmem>>) target_semaphore(%36 : memref<!tpu.dma_semaphore, #tpu.memory_space<semaphore_mem>>)
    %c4_i32 = arith.constant 4 : i32
    %37 = arith.addi %0, %c4_i32 : i32
    %38 = arith.index_cast %37 : i32 to index
    %39 = memref.load %arg1[%38] : memref<16xi32, #tpu.memory_space<smem>>
    %c4_i32_16 = arith.constant 4 : i32
    %c4_i32_17 = arith.constant 4 : i32
    %c0_i32_18 = arith.constant 0 : i32
    %40 = tpu.memref_slice %arg2[%39, %c0_i32_18] : memref<64x128xf32, #tpu.memory_space<any>> -> memref<1x128xf32, #tpu.memory_space<any>>
    %41 = tpu.memref_squeeze %40 : memref<1x128xf32, #tpu.memory_space<any>> -> memref<128xf32, #tpu.memory_space<any>>
    %c0_i32_19 = arith.constant 0 : i32
    %42 = tpu.memref_slice %arg3[%c4_i32_16, %c0_i32_19] : memref<16x128xf32, #tpu.memory_space<vmem>> -> memref<1x128xf32, #tpu.memory_space<vmem>>
    %43 = tpu.memref_squeeze %42 : memref<1x128xf32, #tpu.memory_space<vmem>> -> memref<128xf32, #tpu.memory_space<vmem>>
    %44 = tpu.memref_slice %arg4[%c4_i32_17] : memref<16x!tpu.dma_semaphore, #tpu.memory_space<semaphore_mem>> -> memref<1x!tpu.dma_semaphore, #tpu.memory_space<semaphore_mem>>
    %45 = tpu.memref_squeeze %44 : memref<1x!tpu.dma_semaphore, #tpu.memory_space<semaphore_mem>> -> memref<!tpu.dma_semaphore, #tpu.memory_space<semaphore_mem>>
    tpu.enqueue_dma source(%41 : memref<128xf32, #tpu.memory_space<any>>) target(%43 : memref<128xf32, #tpu.memory_space<vmem>>) target_semaphore(%45 : memref<!tpu.dma_semaphore, #tpu.memory_space<semaphore_mem>>)
    %c5_i32 = arith.constant 5 : i32
    %46 = arith.addi %0, %c5_i32 : i32
    %47 = arith.index_cast %46 : i32 to index
    %48 = memref.load %arg1[%47] : memref<16xi32, #tpu.memory_space<smem>>
    %c5_i32_20 = arith.constant 5 : i32
    %c5_i32_21 = arith.constant 5 : i32
    %c0_i32_22 = arith.constant 0 : i32
    %49 = tpu.memref_slice %arg2[%48, %c0_i32_22] : memref<64x128xf32, #tpu.memory_space<any>> -> memref<1x128xf32, #tpu.memory_space<any>>
    %50 = tpu.memref_squeeze %49 : memref<1x128xf32, #tpu.memory_space<any>> -> memref<128xf32, #tpu.memory_space<any>>
    %c0_i32_23 = arith.constant 0 : i32
    %51 = tpu.memref_slice %arg3[%c5_i32_20, %c0_i32_23] : memref<16x128xf32, #tpu.memory_space<vmem>> -> memref<1x128xf32, #tpu.memory_space<vmem>>
    %52 = tpu.memref_squeeze %51 : memref<1x128xf32, #tpu.memory_space<vmem>> -> memref<128xf32, #tpu.memory_space<vmem>>
    %53 = tpu.memref_slice %arg4[%c5_i32_21] : memref<16x!tpu.dma_semaphore, #tpu.memory_space<semaphore_mem>> -> memref<1x!tpu.dma_semaphore, #tpu.memory_space<semaphore_mem>>
    %54 = tpu.memref_squeeze %53 : memref<1x!tpu.dma_semaphore, #tpu.memory_space<semaphore_mem>> -> memref<!tpu.dma_semaphore, #tpu.memory_space<semaphore_mem>>
    tpu.enqueue_dma source(%50 : memref<128xf32, #tpu.memory_space<any>>) target(%52 : memref<128xf32, #tpu.memory_space<vmem>>) target_semaphore(%54 : memref<!tpu.dma_semaphore, #tpu.memory_space<semaphore_mem>>)
    %c6_i32 = arith.constant 6 : i32
    %55 = arith.addi %0, %c6_i32 : i32
    %56 = arith.index_cast %55 : i32 to index
    %57 = memref.load %arg1[%56] : memref<16xi32, #tpu.memory_space<smem>>
    %c6_i32_24 = arith.constant 6 : i32
    %c6_i32_25 = arith.constant 6 : i32
    %c0_i32_26 = arith.constant 0 : i32
    %58 = tpu.memref_slice %arg2[%57, %c0_i32_26] : memref<64x128xf32, #tpu.memory_space<any>> -> memref<1x128xf32, #tpu.memory_space<any>>
    %59 = tpu.memref_squeeze %58 : memref<1x128xf32, #tpu.memory_space<any>> -> memref<128xf32, #tpu.memory_space<any>>
    %c0_i32_27 = arith.constant 0 : i32
    %60 = tpu.memref_slice %arg3[%c6_i32_24, %c0_i32_27] : memref<16x128xf32, #tpu.memory_space<vmem>> -> memref<1x128xf32, #tpu.memory_space<vmem>>
    %61 = tpu.memref_squeeze %60 : memref<1x128xf32, #tpu.memory_space<vmem>> -> memref<128xf32, #tpu.memory_space<vmem>>
    %62 = tpu.memref_slice %arg4[%c6_i32_25] : memref<16x!tpu.dma_semaphore, #tpu.memory_space<semaphore_mem>> -> memref<1x!tpu.dma_semaphore, #tpu.memory_space<semaphore_mem>>
    %63 = tpu.memref_squeeze %62 : memref<1x!tpu.dma_semaphore, #tpu.memory_space<semaphore_mem>> -> memref<!tpu.dma_semaphore, #tpu.memory_space<semaphore_mem>>
    tpu.enqueue_dma source(%59 : memref<128xf32, #tpu.memory_space<any>>) target(%61 : memref<128xf32, #tpu.memory_space<vmem>>) target_semaphore(%63 : memref<!tpu.dma_semaphore, #tpu.memory_space<semaphore_mem>>)
    %c7_i32 = arith.constant 7 : i32
    %64 = arith.addi %0, %c7_i32 : i32
    %65 = arith.index_cast %64 : i32 to index
    %66 = memref.load %arg1[%65] : memref<16xi32, #tpu.memory_space<smem>>
    %c7_i32_28 = arith.constant 7 : i32
    %c7_i32_29 = arith.constant 7 : i32
    %c0_i32_30 = arith.constant 0 : i32
    %67 = tpu.memref_slice %arg2[%66, %c0_i32_30] : memref<64x128xf32, #tpu.memory_space<any>> -> memref<1x128xf32, #tpu.memory_space<any>>
    %68 = tpu.memref_squeeze %67 : memref<1x128xf32, #tpu.memory_space<any>> -> memref<128xf32, #tpu.memory_space<any>>
    %c0_i32_31 = arith.constant 0 : i32
    %69 = tpu.memref_slice %arg3[%c7_i32_28, %c0_i32_31] : memref<16x128xf32, #tpu.memory_space<vmem>> -> memref<1x128xf32, #tpu.memory_space<vmem>>
    %70 = tpu.memref_squeeze %69 : memref<1x128xf32, #tpu.memory_space<vmem>> -> memref<128xf32, #tpu.memory_space<vmem>>
    %71 = tpu.memref_slice %arg4[%c7_i32_29] : memref<16x!tpu.dma_semaphore, #tpu.memory_space<semaphore_mem>> -> memref<1x!tpu.dma_semaphore, #tpu.memory_space<semaphore_mem>>
    %72 = tpu.memref_squeeze %71 : memref<1x!tpu.dma_semaphore, #tpu.memory_space<semaphore_mem>> -> memref<!tpu.dma_semaphore, #tpu.memory_space<semaphore_mem>>
    tpu.enqueue_dma source(%68 : memref<128xf32, #tpu.memory_space<any>>) target(%70 : memref<128xf32, #tpu.memory_space<vmem>>) target_semaphore(%72 : memref<!tpu.dma_semaphore, #tpu.memory_space<semaphore_mem>>)
    %c8_i32 = arith.constant 8 : i32
    %73 = arith.addi %0, %c8_i32 : i32
    %74 = arith.index_cast %73 : i32 to index
    %75 = memref.load %arg1[%74] : memref<16xi32, #tpu.memory_space<smem>>
    %c8_i32_32 = arith.constant 8 : i32
    %c8_i32_33 = arith.constant 8 : i32
    %c0_i32_34 = arith.constant 0 : i32
    %76 = tpu.memref_slice %arg2[%75, %c0_i32_34] : memref<64x128xf32, #tpu.memory_space<any>> -> memref<1x128xf32, #tpu.memory_space<any>>
    %77 = tpu.memref_squeeze %76 : memref<1x128xf32, #tpu.memory_space<any>> -> memref<128xf32, #tpu.memory_space<any>>
    %c0_i32_35 = arith.constant 0 : i32
    %78 = tpu.memref_slice %arg3[%c8_i32_32, %c0_i32_35] : memref<16x128xf32, #tpu.memory_space<vmem>> -> memref<1x128xf32, #tpu.memory_space<vmem>>
    %79 = tpu.memref_squeeze %78 : memref<1x128xf32, #tpu.memory_space<vmem>> -> memref<128xf32, #tpu.memory_space<vmem>>
    %80 = tpu.memref_slice %arg4[%c8_i32_33] : memref<16x!tpu.dma_semaphore, #tpu.memory_space<semaphore_mem>> -> memref<1x!tpu.dma_semaphore, #tpu.memory_space<semaphore_mem>>
    %81 = tpu.memref_squeeze %80 : memref<1x!tpu.dma_semaphore, #tpu.memory_space<semaphore_mem>> -> memref<!tpu.dma_semaphore, #tpu.memory_space<semaphore_mem>>
    tpu.enqueue_dma source(%77 : memref<128xf32, #tpu.memory_space<any>>) target(%79 : memref<128xf32, #tpu.memory_space<vmem>>) target_semaphore(%81 : memref<!tpu.dma_semaphore, #tpu.memory_space<semaphore_mem>>)
    %c9_i32 = arith.constant 9 : i32
    %82 = arith.addi %0, %c9_i32 : i32
    %83 = arith.index_cast %82 : i32 to index
    %84 = memref.load %arg1[%83] : memref<16xi32, #tpu.memory_space<smem>>
    %c9_i32_36 = arith.constant 9 : i32
    %c9_i32_37 = arith.constant 9 : i32
    %c0_i32_38 = arith.constant 0 : i32
    %85 = tpu.memref_slice %arg2[%84, %c0_i32_38] : memref<64x128xf32, #tpu.memory_space<any>> -> memref<1x128xf32, #tpu.memory_space<any>>
    %86 = tpu.memref_squeeze %85 : memref<1x128xf32, #tpu.memory_space<any>> -> memref<128xf32, #tpu.memory_space<any>>
    %c0_i32_39 = arith.constant 0 : i32
    %87 = tpu.memref_slice %arg3[%c9_i32_36, %c0_i32_39] : memref<16x128xf32, #tpu.memory_space<vmem>> -> memref<1x128xf32, #tpu.memory_space<vmem>>
    %88 = tpu.memref_squeeze %87 : memref<1x128xf32, #tpu.memory_space<vmem>> -> memref<128xf32, #tpu.memory_space<vmem>>
    %89 = tpu.memref_slice %arg4[%c9_i32_37] : memref<16x!tpu.dma_semaphore, #tpu.memory_space<semaphore_mem>> -> memref<1x!tpu.dma_semaphore, #tpu.memory_space<semaphore_mem>>
    %90 = tpu.memref_squeeze %89 : memref<1x!tpu.dma_semaphore, #tpu.memory_space<semaphore_mem>> -> memref<!tpu.dma_semaphore, #tpu.memory_space<semaphore_mem>>
    tpu.enqueue_dma source(%86 : memref<128xf32, #tpu.memory_space<any>>) target(%88 : memref<128xf32, #tpu.memory_space<vmem>>) target_semaphore(%90 : memref<!tpu.dma_semaphore, #tpu.memory_space<semaphore_mem>>)
    %c10_i32 = arith.constant 10 : i32
    %91 = arith.addi %0, %c10_i32 : i32
    %92 = arith.index_cast %91 : i32 to index
    %93 = memref.load %arg1[%92] : memref<16xi32, #tpu.memory_space<smem>>
    %c10_i32_40 = arith.constant 10 : i32
    %c10_i32_41 = arith.constant 10 : i32
    %c0_i32_42 = arith.constant 0 : i32
    %94 = tpu.memref_slice %arg2[%93, %c0_i32_42] : memref<64x128xf32, #tpu.memory_space<any>> -> memref<1x128xf32, #tpu.memory_space<any>>
    %95 = tpu.memref_squeeze %94 : memref<1x128xf32, #tpu.memory_space<any>> -> memref<128xf32, #tpu.memory_space<any>>
    %c0_i32_43 = arith.constant 0 : i32
    %96 = tpu.memref_slice %arg3[%c10_i32_40, %c0_i32_43] : memref<16x128xf32, #tpu.memory_space<vmem>> -> memref<1x128xf32, #tpu.memory_space<vmem>>
    %97 = tpu.memref_squeeze %96 : memref<1x128xf32, #tpu.memory_space<vmem>> -> memref<128xf32, #tpu.memory_space<vmem>>
    %98 = tpu.memref_slice %arg4[%c10_i32_41] : memref<16x!tpu.dma_semaphore, #tpu.memory_space<semaphore_mem>> -> memref<1x!tpu.dma_semaphore, #tpu.memory_space<semaphore_mem>>
    %99 = tpu.memref_squeeze %98 : memref<1x!tpu.dma_semaphore, #tpu.memory_space<semaphore_mem>> -> memref<!tpu.dma_semaphore, #tpu.memory_space<semaphore_mem>>
    tpu.enqueue_dma source(%95 : memref<128xf32, #tpu.memory_space<any>>) target(%97 : memref<128xf32, #tpu.memory_space<vmem>>) target_semaphore(%99 : memref<!tpu.dma_semaphore, #tpu.memory_space<semaphore_mem>>)
    %c11_i32 = arith.constant 11 : i32
    %100 = arith.addi %0, %c11_i32 : i32
    %101 = arith.index_cast %100 : i32 to index
    %102 = memref.load %arg1[%101] : memref<16xi32, #tpu.memory_space<smem>>
    %c11_i32_44 = arith.constant 11 : i32
    %c11_i32_45 = arith.constant 11 : i32
    %c0_i32_46 = arith.constant 0 : i32
    %103 = tpu.memref_slice %arg2[%102, %c0_i32_46] : memref<64x128xf32, #tpu.memory_space<any>> -> memref<1x128xf32, #tpu.memory_space<any>>
    %104 = tpu.memref_squeeze %103 : memref<1x128xf32, #tpu.memory_space<any>> -> memref<128xf32, #tpu.memory_space<any>>
    %c0_i32_47 = arith.constant 0 : i32
    %105 = tpu.memref_slice %arg3[%c11_i32_44, %c0_i32_47] : memref<16x128xf32, #tpu.memory_space<vmem>> -> memref<1x128xf32, #tpu.memory_space<vmem>>
    %106 = tpu.memref_squeeze %105 : memref<1x128xf32, #tpu.memory_space<vmem>> -> memref<128xf32, #tpu.memory_space<vmem>>
    %107 = tpu.memref_slice %arg4[%c11_i32_45] : memref<16x!tpu.dma_semaphore, #tpu.memory_space<semaphore_mem>> -> memref<1x!tpu.dma_semaphore, #tpu.memory_space<semaphore_mem>>
    %108 = tpu.memref_squeeze %107 : memref<1x!tpu.dma_semaphore, #tpu.memory_space<semaphore_mem>> -> memref<!tpu.dma_semaphore, #tpu.memory_space<semaphore_mem>>
    tpu.enqueue_dma source(%104 : memref<128xf32, #tpu.memory_space<any>>) target(%106 : memref<128xf32, #tpu.memory_space<vmem>>) target_semaphore(%108 : memref<!tpu.dma_semaphore, #tpu.memory_space<semaphore_mem>>)
    %c12_i32 = arith.constant 12 : i32
    %109 = arith.addi %0, %c12_i32 : i32
    %110 = arith.index_cast %109 : i32 to index
    %111 = memref.load %arg1[%110] : memref<16xi32, #tpu.memory_space<smem>>
    %c12_i32_48 = arith.constant 12 : i32
    %c12_i32_49 = arith.constant 12 : i32
    %c0_i32_50 = arith.constant 0 : i32
    %112 = tpu.memref_slice %arg2[%111, %c0_i32_50] : memref<64x128xf32, #tpu.memory_space<any>> -> memref<1x128xf32, #tpu.memory_space<any>>
    %113 = tpu.memref_squeeze %112 : memref<1x128xf32, #tpu.memory_space<any>> -> memref<128xf32, #tpu.memory_space<any>>
    %c0_i32_51 = arith.constant 0 : i32
    %114 = tpu.memref_slice %arg3[%c12_i32_48, %c0_i32_51] : memref<16x128xf32, #tpu.memory_space<vmem>> -> memref<1x128xf32, #tpu.memory_space<vmem>>
    %115 = tpu.memref_squeeze %114 : memref<1x128xf32, #tpu.memory_space<vmem>> -> memref<128xf32, #tpu.memory_space<vmem>>
    %116 = tpu.memref_slice %arg4[%c12_i32_49] : memref<16x!tpu.dma_semaphore, #tpu.memory_space<semaphore_mem>> -> memref<1x!tpu.dma_semaphore, #tpu.memory_space<semaphore_mem>>
    %117 = tpu.memref_squeeze %116 : memref<1x!tpu.dma_semaphore, #tpu.memory_space<semaphore_mem>> -> memref<!tpu.dma_semaphore, #tpu.memory_space<semaphore_mem>>
    tpu.enqueue_dma source(%113 : memref<128xf32, #tpu.memory_space<any>>) target(%115 : memref<128xf32, #tpu.memory_space<vmem>>) target_semaphore(%117 : memref<!tpu.dma_semaphore, #tpu.memory_space<semaphore_mem>>)
    %c13_i32 = arith.constant 13 : i32
    %118 = arith.addi %0, %c13_i32 : i32
    %119 = arith.index_cast %118 : i32 to index
    %120 = memref.load %arg1[%119] : memref<16xi32, #tpu.memory_space<smem>>
    %c13_i32_52 = arith.constant 13 : i32
    %c13_i32_53 = arith.constant 13 : i32
    %c0_i32_54 = arith.constant 0 : i32
    %121 = tpu.memref_slice %arg2[%120, %c0_i32_54] : memref<64x128xf32, #tpu.memory_space<any>> -> memref<1x128xf32, #tpu.memory_space<any>>
    %122 = tpu.memref_squeeze %121 : memref<1x128xf32, #tpu.memory_space<any>> -> memref<128xf32, #tpu.memory_space<any>>
    %c0_i32_55 = arith.constant 0 : i32
    %123 = tpu.memref_slice %arg3[%c13_i32_52, %c0_i32_55] : memref<16x128xf32, #tpu.memory_space<vmem>> -> memref<1x128xf32, #tpu.memory_space<vmem>>
    %124 = tpu.memref_squeeze %123 : memref<1x128xf32, #tpu.memory_space<vmem>> -> memref<128xf32, #tpu.memory_space<vmem>>
    %125 = tpu.memref_slice %arg4[%c13_i32_53] : memref<16x!tpu.dma_semaphore, #tpu.memory_space<semaphore_mem>> -> memref<1x!tpu.dma_semaphore, #tpu.memory_space<semaphore_mem>>
    %126 = tpu.memref_squeeze %125 : memref<1x!tpu.dma_semaphore, #tpu.memory_space<semaphore_mem>> -> memref<!tpu.dma_semaphore, #tpu.memory_space<semaphore_mem>>
    tpu.enqueue_dma source(%122 : memref<128xf32, #tpu.memory_space<any>>) target(%124 : memref<128xf32, #tpu.memory_space<vmem>>) target_semaphore(%126 : memref<!tpu.dma_semaphore, #tpu.memory_space<semaphore_mem>>)
    %c14_i32 = arith.constant 14 : i32
    %127 = arith.addi %0, %c14_i32 : i32
    %128 = arith.index_cast %127 : i32 to index
    %129 = memref.load %arg1[%128] : memref<16xi32, #tpu.memory_space<smem>>
    %c14_i32_56 = arith.constant 14 : i32
    %c14_i32_57 = arith.constant 14 : i32
    %c0_i32_58 = arith.constant 0 : i32
    %130 = tpu.memref_slice %arg2[%129, %c0_i32_58] : memref<64x128xf32, #tpu.memory_space<any>> -> memref<1x128xf32, #tpu.memory_space<any>>
    %131 = tpu.memref_squeeze %130 : memref<1x128xf32, #tpu.memory_space<any>> -> memref<128xf32, #tpu.memory_space<any>>
    %c0_i32_59 = arith.constant 0 : i32
    %132 = tpu.memref_slice %arg3[%c14_i32_56, %c0_i32_59] : memref<16x128xf32, #tpu.memory_space<vmem>> -> memref<1x128xf32, #tpu.memory_space<vmem>>
    %133 = tpu.memref_squeeze %132 : memref<1x128xf32, #tpu.memory_space<vmem>> -> memref<128xf32, #tpu.memory_space<vmem>>
    %134 = tpu.memref_slice %arg4[%c14_i32_57] : memref<16x!tpu.dma_semaphore, #tpu.memory_space<semaphore_mem>> -> memref<1x!tpu.dma_semaphore, #tpu.memory_space<semaphore_mem>>
    %135 = tpu.memref_squeeze %134 : memref<1x!tpu.dma_semaphore, #tpu.memory_space<semaphore_mem>> -> memref<!tpu.dma_semaphore, #tpu.memory_space<semaphore_mem>>
    tpu.enqueue_dma source(%131 : memref<128xf32, #tpu.memory_space<any>>) target(%133 : memref<128xf32, #tpu.memory_space<vmem>>) target_semaphore(%135 : memref<!tpu.dma_semaphore, #tpu.memory_space<semaphore_mem>>)
    %c15_i32 = arith.constant 15 : i32
    %136 = arith.addi %0, %c15_i32 : i32
    %137 = arith.index_cast %136 : i32 to index
    %138 = memref.load %arg1[%137] : memref<16xi32, #tpu.memory_space<smem>>
    %c15_i32_60 = arith.constant 15 : i32
    %c15_i32_61 = arith.constant 15 : i32
    %c0_i32_62 = arith.constant 0 : i32
    %139 = tpu.memref_slice %arg2[%138, %c0_i32_62] : memref<64x128xf32, #tpu.memory_space<any>> -> memref<1x128xf32, #tpu.memory_space<any>>
    %140 = tpu.memref_squeeze %139 : memref<1x128xf32, #tpu.memory_space<any>> -> memref<128xf32, #tpu.memory_space<any>>
    %c0_i32_63 = arith.constant 0 : i32
    %141 = tpu.memref_slice %arg3[%c15_i32_60, %c0_i32_63] : memref<16x128xf32, #tpu.memory_space<vmem>> -> memref<1x128xf32, #tpu.memory_space<vmem>>
    %142 = tpu.memref_squeeze %141 : memref<1x128xf32, #tpu.memory_space<vmem>> -> memref<128xf32, #tpu.memory_space<vmem>>
    %143 = tpu.memref_slice %arg4[%c15_i32_61] : memref<16x!tpu.dma_semaphore, #tpu.memory_space<semaphore_mem>> -> memref<1x!tpu.dma_semaphore, #tpu.memory_space<semaphore_mem>>
    %144 = tpu.memref_squeeze %143 : memref<1x!tpu.dma_semaphore, #tpu.memory_space<semaphore_mem>> -> memref<!tpu.dma_semaphore, #tpu.memory_space<semaphore_mem>>
    tpu.enqueue_dma source(%140 : memref<128xf32, #tpu.memory_space<any>>) target(%142 : memref<128xf32, #tpu.memory_space<vmem>>) target_semaphore(%144 : memref<!tpu.dma_semaphore, #tpu.memory_space<semaphore_mem>>)
    %c0_i32_64 = arith.constant 0 : i32
    %c0_i32_65 = arith.constant 0 : i32
    %c0_i32_66 = arith.constant 0 : i32
    %145 = tpu.memref_slice %arg2[%3, %c0_i32_66] : memref<64x128xf32, #tpu.memory_space<any>> -> memref<1x128xf32, #tpu.memory_space<any>>
    %146 = tpu.memref_squeeze %145 : memref<1x128xf32, #tpu.memory_space<any>> -> memref<128xf32, #tpu.memory_space<any>>
    %c0_i32_67 = arith.constant 0 : i32
    %147 = tpu.memref_slice %arg3[%c0_i32_64, %c0_i32_67] : memref<16x128xf32, #tpu.memory_space<vmem>> -> memref<1x128xf32, #tpu.memory_space<vmem>>
    %148 = tpu.memref_squeeze %147 : memref<1x128xf32, #tpu.memory_space<vmem>> -> memref<128xf32, #tpu.memory_space<vmem>>
    %149 = tpu.memref_slice %arg4[%c0_i32_65] : memref<16x!tpu.dma_semaphore, #tpu.memory_space<semaphore_mem>> -> memref<1x!tpu.dma_semaphore, #tpu.memory_space<semaphore_mem>>
    %150 = tpu.memref_squeeze %149 : memref<1x!tpu.dma_semaphore, #tpu.memory_space<semaphore_mem>> -> memref<!tpu.dma_semaphore, #tpu.memory_space<semaphore_mem>>
    tpu.wait_dma2 semaphore(%150 : memref<!tpu.dma_semaphore, #tpu.memory_space<semaphore_mem>>) src(%146 : memref<128xf32, #tpu.memory_space<any>>) dst(%148 : memref<128xf32, #tpu.memory_space<vmem>>)
    %c1_i32_68 = arith.constant 1 : i32
    %c1_i32_69 = arith.constant 1 : i32
    %c0_i32_70 = arith.constant 0 : i32
    %151 = tpu.memref_slice %arg2[%12, %c0_i32_70] : memref<64x128xf32, #tpu.memory_space<any>> -> memref<1x128xf32, #tpu.memory_space<any>>
    %152 = tpu.memref_squeeze %151 : memref<1x128xf32, #tpu.memory_space<any>> -> memref<128xf32, #tpu.memory_space<any>>
    %c0_i32_71 = arith.constant 0 : i32
    %153 = tpu.memref_slice %arg3[%c1_i32_68, %c0_i32_71] : memref<16x128xf32, #tpu.memory_space<vmem>> -> memref<1x128xf32, #tpu.memory_space<vmem>>
    %154 = tpu.memref_squeeze %153 : memref<1x128xf32, #tpu.memory_space<vmem>> -> memref<128xf32, #tpu.memory_space<vmem>>
    %155 = tpu.memref_slice %arg4[%c1_i32_69] : memref<16x!tpu.dma_semaphore, #tpu.memory_space<semaphore_mem>> -> memref<1x!tpu.dma_semaphore, #tpu.memory_space<semaphore_mem>>
    %156 = tpu.memref_squeeze %155 : memref<1x!tpu.dma_semaphore, #tpu.memory_space<semaphore_mem>> -> memref<!tpu.dma_semaphore, #tpu.memory_space<semaphore_mem>>
    tpu.wait_dma2 semaphore(%156 : memref<!tpu.dma_semaphore, #tpu.memory_space<semaphore_mem>>) src(%152 : memref<128xf32, #tpu.memory_space<any>>) dst(%154 : memref<128xf32, #tpu.memory_space<vmem>>)
    %c2_i32_72 = arith.constant 2 : i32
    %c2_i32_73 = arith.constant 2 : i32
    %c0_i32_74 = arith.constant 0 : i32
    %157 = tpu.memref_slice %arg2[%21, %c0_i32_74] : memref<64x128xf32, #tpu.memory_space<any>> -> memref<1x128xf32, #tpu.memory_space<any>>
    %158 = tpu.memref_squeeze %157 : memref<1x128xf32, #tpu.memory_space<any>> -> memref<128xf32, #tpu.memory_space<any>>
    %c0_i32_75 = arith.constant 0 : i32
    %159 = tpu.memref_slice %arg3[%c2_i32_72, %c0_i32_75] : memref<16x128xf32, #tpu.memory_space<vmem>> -> memref<1x128xf32, #tpu.memory_space<vmem>>
    %160 = tpu.memref_squeeze %159 : memref<1x128xf32, #tpu.memory_space<vmem>> -> memref<128xf32, #tpu.memory_space<vmem>>
    %161 = tpu.memref_slice %arg4[%c2_i32_73] : memref<16x!tpu.dma_semaphore, #tpu.memory_space<semaphore_mem>> -> memref<1x!tpu.dma_semaphore, #tpu.memory_space<semaphore_mem>>
    %162 = tpu.memref_squeeze %161 : memref<1x!tpu.dma_semaphore, #tpu.memory_space<semaphore_mem>> -> memref<!tpu.dma_semaphore, #tpu.memory_space<semaphore_mem>>
    tpu.wait_dma2 semaphore(%162 : memref<!tpu.dma_semaphore, #tpu.memory_space<semaphore_mem>>) src(%158 : memref<128xf32, #tpu.memory_space<any>>) dst(%160 : memref<128xf32, #tpu.memory_space<vmem>>)
    %c3_i32_76 = arith.constant 3 : i32
    %c3_i32_77 = arith.constant 3 : i32
    %c0_i32_78 = arith.constant 0 : i32
    %163 = tpu.memref_slice %arg2[%30, %c0_i32_78] : memref<64x128xf32, #tpu.memory_space<any>> -> memref<1x128xf32, #tpu.memory_space<any>>
    %164 = tpu.memref_squeeze %163 : memref<1x128xf32, #tpu.memory_space<any>> -> memref<128xf32, #tpu.memory_space<any>>
    %c0_i32_79 = arith.constant 0 : i32
    %165 = tpu.memref_slice %arg3[%c3_i32_76, %c0_i32_79] : memref<16x128xf32, #tpu.memory_space<vmem>> -> memref<1x128xf32, #tpu.memory_space<vmem>>
    %166 = tpu.memref_squeeze %165 : memref<1x128xf32, #tpu.memory_space<vmem>> -> memref<128xf32, #tpu.memory_space<vmem>>
    %167 = tpu.memref_slice %arg4[%c3_i32_77] : memref<16x!tpu.dma_semaphore, #tpu.memory_space<semaphore_mem>> -> memref<1x!tpu.dma_semaphore, #tpu.memory_space<semaphore_mem>>
    %168 = tpu.memref_squeeze %167 : memref<1x!tpu.dma_semaphore, #tpu.memory_space<semaphore_mem>> -> memref<!tpu.dma_semaphore, #tpu.memory_space<semaphore_mem>>
    tpu.wait_dma2 semaphore(%168 : memref<!tpu.dma_semaphore, #tpu.memory_space<semaphore_mem>>) src(%164 : memref<128xf32, #tpu.memory_space<any>>) dst(%166 : memref<128xf32, #tpu.memory_space<vmem>>)
    %c4_i32_80 = arith.constant 4 : i32
    %c4_i32_81 = arith.constant 4 : i32
    %c0_i32_82 = arith.constant 0 : i32
    %169 = tpu.memref_slice %arg2[%39, %c0_i32_82] : memref<64x128xf32, #tpu.memory_space<any>> -> memref<1x128xf32, #tpu.memory_space<any>>
    %170 = tpu.memref_squeeze %169 : memref<1x128xf32, #tpu.memory_space<any>> -> memref<128xf32, #tpu.memory_space<any>>
    %c0_i32_83 = arith.constant 0 : i32
    %171 = tpu.memref_slice %arg3[%c4_i32_80, %c0_i32_83] : memref<16x128xf32, #tpu.memory_space<vmem>> -> memref<1x128xf32, #tpu.memory_space<vmem>>
    %172 = tpu.memref_squeeze %171 : memref<1x128xf32, #tpu.memory_space<vmem>> -> memref<128xf32, #tpu.memory_space<vmem>>
    %173 = tpu.memref_slice %arg4[%c4_i32_81] : memref<16x!tpu.dma_semaphore, #tpu.memory_space<semaphore_mem>> -> memref<1x!tpu.dma_semaphore, #tpu.memory_space<semaphore_mem>>
    %174 = tpu.memref_squeeze %173 : memref<1x!tpu.dma_semaphore, #tpu.memory_space<semaphore_mem>> -> memref<!tpu.dma_semaphore, #tpu.memory_space<semaphore_mem>>
    tpu.wait_dma2 semaphore(%174 : memref<!tpu.dma_semaphore, #tpu.memory_space<semaphore_mem>>) src(%170 : memref<128xf32, #tpu.memory_space<any>>) dst(%172 : memref<128xf32, #tpu.memory_space<vmem>>)
    %c5_i32_84 = arith.constant 5 : i32
    %c5_i32_85 = arith.constant 5 : i32
    %c0_i32_86 = arith.constant 0 : i32
    %175 = tpu.memref_slice %arg2[%48, %c0_i32_86] : memref<64x128xf32, #tpu.memory_space<any>> -> memref<1x128xf32, #tpu.memory_space<any>>
    %176 = tpu.memref_squeeze %175 : memref<1x128xf32, #tpu.memory_space<any>> -> memref<128xf32, #tpu.memory_space<any>>
    %c0_i32_87 = arith.constant 0 : i32
    %177 = tpu.memref_slice %arg3[%c5_i32_84, %c0_i32_87] : memref<16x128xf32, #tpu.memory_space<vmem>> -> memref<1x128xf32, #tpu.memory_space<vmem>>
    %178 = tpu.memref_squeeze %177 : memref<1x128xf32, #tpu.memory_space<vmem>> -> memref<128xf32, #tpu.memory_space<vmem>>
    %179 = tpu.memref_slice %arg4[%c5_i32_85] : memref<16x!tpu.dma_semaphore, #tpu.memory_space<semaphore_mem>> -> memref<1x!tpu.dma_semaphore, #tpu.memory_space<semaphore_mem>>
    %180 = tpu.memref_squeeze %179 : memref<1x!tpu.dma_semaphore, #tpu.memory_space<semaphore_mem>> -> memref<!tpu.dma_semaphore, #tpu.memory_space<semaphore_mem>>
    tpu.wait_dma2 semaphore(%180 : memref<!tpu.dma_semaphore, #tpu.memory_space<semaphore_mem>>) src(%176 : memref<128xf32, #tpu.memory_space<any>>) dst(%178 : memref<128xf32, #tpu.memory_space<vmem>>)
    %c6_i32_88 = arith.constant 6 : i32
    %c6_i32_89 = arith.constant 6 : i32
    %c0_i32_90 = arith.constant 0 : i32
    %181 = tpu.memref_slice %arg2[%57, %c0_i32_90] : memref<64x128xf32, #tpu.memory_space<any>> -> memref<1x128xf32, #tpu.memory_space<any>>
    %182 = tpu.memref_squeeze %181 : memref<1x128xf32, #tpu.memory_space<any>> -> memref<128xf32, #tpu.memory_space<any>>
    %c0_i32_91 = arith.constant 0 : i32
    %183 = tpu.memref_slice %arg3[%c6_i32_88, %c0_i32_91] : memref<16x128xf32, #tpu.memory_space<vmem>> -> memref<1x128xf32, #tpu.memory_space<vmem>>
    %184 = tpu.memref_squeeze %183 : memref<1x128xf32, #tpu.memory_space<vmem>> -> memref<128xf32, #tpu.memory_space<vmem>>
    %185 = tpu.memref_slice %arg4[%c6_i32_89] : memref<16x!tpu.dma_semaphore, #tpu.memory_space<semaphore_mem>> -> memref<1x!tpu.dma_semaphore, #tpu.memory_space<semaphore_mem>>
    %186 = tpu.memref_squeeze %185 : memref<1x!tpu.dma_semaphore, #tpu.memory_space<semaphore_mem>> -> memref<!tpu.dma_semaphore, #tpu.memory_space<semaphore_mem>>
    tpu.wait_dma2 semaphore(%186 : memref<!tpu.dma_semaphore, #tpu.memory_space<semaphore_mem>>) src(%182 : memref<128xf32, #tpu.memory_space<any>>) dst(%184 : memref<128xf32, #tpu.memory_space<vmem>>)
    %c7_i32_92 = arith.constant 7 : i32
    %c7_i32_93 = arith.constant 7 : i32
    %c0_i32_94 = arith.constant 0 : i32
    %187 = tpu.memref_slice %arg2[%66, %c0_i32_94] : memref<64x128xf32, #tpu.memory_space<any>> -> memref<1x128xf32, #tpu.memory_space<any>>
    %188 = tpu.memref_squeeze %187 : memref<1x128xf32, #tpu.memory_space<any>> -> memref<128xf32, #tpu.memory_space<any>>
    %c0_i32_95 = arith.constant 0 : i32
    %189 = tpu.memref_slice %arg3[%c7_i32_92, %c0_i32_95] : memref<16x128xf32, #tpu.memory_space<vmem>> -> memref<1x128xf32, #tpu.memory_space<vmem>>
    %190 = tpu.memref_squeeze %189 : memref<1x128xf32, #tpu.memory_space<vmem>> -> memref<128xf32, #tpu.memory_space<vmem>>
    %191 = tpu.memref_slice %arg4[%c7_i32_93] : memref<16x!tpu.dma_semaphore, #tpu.memory_space<semaphore_mem>> -> memref<1x!tpu.dma_semaphore, #tpu.memory_space<semaphore_mem>>
    %192 = tpu.memref_squeeze %191 : memref<1x!tpu.dma_semaphore, #tpu.memory_space<semaphore_mem>> -> memref<!tpu.dma_semaphore, #tpu.memory_space<semaphore_mem>>
    tpu.wait_dma2 semaphore(%192 : memref<!tpu.dma_semaphore, #tpu.memory_space<semaphore_mem>>) src(%188 : memref<128xf32, #tpu.memory_space<any>>) dst(%190 : memref<128xf32, #tpu.memory_space<vmem>>)
    %c8_i32_96 = arith.constant 8 : i32
    %c8_i32_97 = arith.constant 8 : i32
    %c0_i32_98 = arith.constant 0 : i32
    %193 = tpu.memref_slice %arg2[%75, %c0_i32_98] : memref<64x128xf32, #tpu.memory_space<any>> -> memref<1x128xf32, #tpu.memory_space<any>>
    %194 = tpu.memref_squeeze %193 : memref<1x128xf32, #tpu.memory_space<any>> -> memref<128xf32, #tpu.memory_space<any>>
    %c0_i32_99 = arith.constant 0 : i32
    %195 = tpu.memref_slice %arg3[%c8_i32_96, %c0_i32_99] : memref<16x128xf32, #tpu.memory_space<vmem>> -> memref<1x128xf32, #tpu.memory_space<vmem>>
    %196 = tpu.memref_squeeze %195 : memref<1x128xf32, #tpu.memory_space<vmem>> -> memref<128xf32, #tpu.memory_space<vmem>>
    %197 = tpu.memref_slice %arg4[%c8_i32_97] : memref<16x!tpu.dma_semaphore, #tpu.memory_space<semaphore_mem>> -> memref<1x!tpu.dma_semaphore, #tpu.memory_space<semaphore_mem>>
    %198 = tpu.memref_squeeze %197 : memref<1x!tpu.dma_semaphore, #tpu.memory_space<semaphore_mem>> -> memref<!tpu.dma_semaphore, #tpu.memory_space<semaphore_mem>>
    tpu.wait_dma2 semaphore(%198 : memref<!tpu.dma_semaphore, #tpu.memory_space<semaphore_mem>>) src(%194 : memref<128xf32, #tpu.memory_space<any>>) dst(%196 : memref<128xf32, #tpu.memory_space<vmem>>)
    %c9_i32_100 = arith.constant 9 : i32
    %c9_i32_101 = arith.constant 9 : i32
    %c0_i32_102 = arith.constant 0 : i32
    %199 = tpu.memref_slice %arg2[%84, %c0_i32_102] : memref<64x128xf32, #tpu.memory_space<any>> -> memref<1x128xf32, #tpu.memory_space<any>>
    %200 = tpu.memref_squeeze %199 : memref<1x128xf32, #tpu.memory_space<any>> -> memref<128xf32, #tpu.memory_space<any>>
    %c0_i32_103 = arith.constant 0 : i32
    %201 = tpu.memref_slice %arg3[%c9_i32_100, %c0_i32_103] : memref<16x128xf32, #tpu.memory_space<vmem>> -> memref<1x128xf32, #tpu.memory_space<vmem>>
    %202 = tpu.memref_squeeze %201 : memref<1x128xf32, #tpu.memory_space<vmem>> -> memref<128xf32, #tpu.memory_space<vmem>>
    %203 = tpu.memref_slice %arg4[%c9_i32_101] : memref<16x!tpu.dma_semaphore, #tpu.memory_space<semaphore_mem>> -> memref<1x!tpu.dma_semaphore, #tpu.memory_space<semaphore_mem>>
    %204 = tpu.memref_squeeze %203 : memref<1x!tpu.dma_semaphore, #tpu.memory_space<semaphore_mem>> -> memref<!tpu.dma_semaphore, #tpu.memory_space<semaphore_mem>>
    tpu.wait_dma2 semaphore(%204 : memref<!tpu.dma_semaphore, #tpu.memory_space<semaphore_mem>>) src(%200 : memref<128xf32, #tpu.memory_space<any>>) dst(%202 : memref<128xf32, #tpu.memory_space<vmem>>)
    %c10_i32_104 = arith.constant 10 : i32
    %c10_i32_105 = arith.constant 10 : i32
    %c0_i32_106 = arith.constant 0 : i32
    %205 = tpu.memref_slice %arg2[%93, %c0_i32_106] : memref<64x128xf32, #tpu.memory_space<any>> -> memref<1x128xf32, #tpu.memory_space<any>>
    %206 = tpu.memref_squeeze %205 : memref<1x128xf32, #tpu.memory_space<any>> -> memref<128xf32, #tpu.memory_space<any>>
    %c0_i32_107 = arith.constant 0 : i32
    %207 = tpu.memref_slice %arg3[%c10_i32_104, %c0_i32_107] : memref<16x128xf32, #tpu.memory_space<vmem>> -> memref<1x128xf32, #tpu.memory_space<vmem>>
    %208 = tpu.memref_squeeze %207 : memref<1x128xf32, #tpu.memory_space<vmem>> -> memref<128xf32, #tpu.memory_space<vmem>>
    %209 = tpu.memref_slice %arg4[%c10_i32_105] : memref<16x!tpu.dma_semaphore, #tpu.memory_space<semaphore_mem>> -> memref<1x!tpu.dma_semaphore, #tpu.memory_space<semaphore_mem>>
    %210 = tpu.memref_squeeze %209 : memref<1x!tpu.dma_semaphore, #tpu.memory_space<semaphore_mem>> -> memref<!tpu.dma_semaphore, #tpu.memory_space<semaphore_mem>>
    tpu.wait_dma2 semaphore(%210 : memref<!tpu.dma_semaphore, #tpu.memory_space<semaphore_mem>>) src(%206 : memref<128xf32, #tpu.memory_space<any>>) dst(%208 : memref<128xf32, #tpu.memory_space<vmem>>)
    %c11_i32_108 = arith.constant 11 : i32
    %c11_i32_109 = arith.constant 11 : i32
    %c0_i32_110 = arith.constant 0 : i32
    %211 = tpu.memref_slice %arg2[%102, %c0_i32_110] : memref<64x128xf32, #tpu.memory_space<any>> -> memref<1x128xf32, #tpu.memory_space<any>>
    %212 = tpu.memref_squeeze %211 : memref<1x128xf32, #tpu.memory_space<any>> -> memref<128xf32, #tpu.memory_space<any>>
    %c0_i32_111 = arith.constant 0 : i32
    %213 = tpu.memref_slice %arg3[%c11_i32_108, %c0_i32_111] : memref<16x128xf32, #tpu.memory_space<vmem>> -> memref<1x128xf32, #tpu.memory_space<vmem>>
    %214 = tpu.memref_squeeze %213 : memref<1x128xf32, #tpu.memory_space<vmem>> -> memref<128xf32, #tpu.memory_space<vmem>>
    %215 = tpu.memref_slice %arg4[%c11_i32_109] : memref<16x!tpu.dma_semaphore, #tpu.memory_space<semaphore_mem>> -> memref<1x!tpu.dma_semaphore, #tpu.memory_space<semaphore_mem>>
    %216 = tpu.memref_squeeze %215 : memref<1x!tpu.dma_semaphore, #tpu.memory_space<semaphore_mem>> -> memref<!tpu.dma_semaphore, #tpu.memory_space<semaphore_mem>>
    tpu.wait_dma2 semaphore(%216 : memref<!tpu.dma_semaphore, #tpu.memory_space<semaphore_mem>>) src(%212 : memref<128xf32, #tpu.memory_space<any>>) dst(%214 : memref<128xf32, #tpu.memory_space<vmem>>)
    %c12_i32_112 = arith.constant 12 : i32
    %c12_i32_113 = arith.constant 12 : i32
    %c0_i32_114 = arith.constant 0 : i32
    %217 = tpu.memref_slice %arg2[%111, %c0_i32_114] : memref<64x128xf32, #tpu.memory_space<any>> -> memref<1x128xf32, #tpu.memory_space<any>>
    %218 = tpu.memref_squeeze %217 : memref<1x128xf32, #tpu.memory_space<any>> -> memref<128xf32, #tpu.memory_space<any>>
    %c0_i32_115 = arith.constant 0 : i32
    %219 = tpu.memref_slice %arg3[%c12_i32_112, %c0_i32_115] : memref<16x128xf32, #tpu.memory_space<vmem>> -> memref<1x128xf32, #tpu.memory_space<vmem>>
    %220 = tpu.memref_squeeze %219 : memref<1x128xf32, #tpu.memory_space<vmem>> -> memref<128xf32, #tpu.memory_space<vmem>>
    %221 = tpu.memref_slice %arg4[%c12_i32_113] : memref<16x!tpu.dma_semaphore, #tpu.memory_space<semaphore_mem>> -> memref<1x!tpu.dma_semaphore, #tpu.memory_space<semaphore_mem>>
    %222 = tpu.memref_squeeze %221 : memref<1x!tpu.dma_semaphore, #tpu.memory_space<semaphore_mem>> -> memref<!tpu.dma_semaphore, #tpu.memory_space<semaphore_mem>>
    tpu.wait_dma2 semaphore(%222 : memref<!tpu.dma_semaphore, #tpu.memory_space<semaphore_mem>>) src(%218 : memref<128xf32, #tpu.memory_space<any>>) dst(%220 : memref<128xf32, #tpu.memory_space<vmem>>)
    %c13_i32_116 = arith.constant 13 : i32
    %c13_i32_117 = arith.constant 13 : i32
    %c0_i32_118 = arith.constant 0 : i32
    %223 = tpu.memref_slice %arg2[%120, %c0_i32_118] : memref<64x128xf32, #tpu.memory_space<any>> -> memref<1x128xf32, #tpu.memory_space<any>>
    %224 = tpu.memref_squeeze %223 : memref<1x128xf32, #tpu.memory_space<any>> -> memref<128xf32, #tpu.memory_space<any>>
    %c0_i32_119 = arith.constant 0 : i32
    %225 = tpu.memref_slice %arg3[%c13_i32_116, %c0_i32_119] : memref<16x128xf32, #tpu.memory_space<vmem>> -> memref<1x128xf32, #tpu.memory_space<vmem>>
    %226 = tpu.memref_squeeze %225 : memref<1x128xf32, #tpu.memory_space<vmem>> -> memref<128xf32, #tpu.memory_space<vmem>>
    %227 = tpu.memref_slice %arg4[%c13_i32_117] : memref<16x!tpu.dma_semaphore, #tpu.memory_space<semaphore_mem>> -> memref<1x!tpu.dma_semaphore, #tpu.memory_space<semaphore_mem>>
    %228 = tpu.memref_squeeze %227 : memref<1x!tpu.dma_semaphore, #tpu.memory_space<semaphore_mem>> -> memref<!tpu.dma_semaphore, #tpu.memory_space<semaphore_mem>>
    tpu.wait_dma2 semaphore(%228 : memref<!tpu.dma_semaphore, #tpu.memory_space<semaphore_mem>>) src(%224 : memref<128xf32, #tpu.memory_space<any>>) dst(%226 : memref<128xf32, #tpu.memory_space<vmem>>)
    %c14_i32_120 = arith.constant 14 : i32
    %c14_i32_121 = arith.constant 14 : i32
    %c0_i32_122 = arith.constant 0 : i32
    %229 = tpu.memref_slice %arg2[%129, %c0_i32_122] : memref<64x128xf32, #tpu.memory_space<any>> -> memref<1x128xf32, #tpu.memory_space<any>>
    %230 = tpu.memref_squeeze %229 : memref<1x128xf32, #tpu.memory_space<any>> -> memref<128xf32, #tpu.memory_space<any>>
    %c0_i32_123 = arith.constant 0 : i32
    %231 = tpu.memref_slice %arg3[%c14_i32_120, %c0_i32_123] : memref<16x128xf32, #tpu.memory_space<vmem>> -> memref<1x128xf32, #tpu.memory_space<vmem>>
    %232 = tpu.memref_squeeze %231 : memref<1x128xf32, #tpu.memory_space<vmem>> -> memref<128xf32, #tpu.memory_space<vmem>>
    %233 = tpu.memref_slice %arg4[%c14_i32_121] : memref<16x!tpu.dma_semaphore, #tpu.memory_space<semaphore_mem>> -> memref<1x!tpu.dma_semaphore, #tpu.memory_space<semaphore_mem>>
    %234 = tpu.memref_squeeze %233 : memref<1x!tpu.dma_semaphore, #tpu.memory_space<semaphore_mem>> -> memref<!tpu.dma_semaphore, #tpu.memory_space<semaphore_mem>>
    tpu.wait_dma2 semaphore(%234 : memref<!tpu.dma_semaphore, #tpu.memory_space<semaphore_mem>>) src(%230 : memref<128xf32, #tpu.memory_space<any>>) dst(%232 : memref<128xf32, #tpu.memory_space<vmem>>)
    %c15_i32_124 = arith.constant 15 : i32
    %c15_i32_125 = arith.constant 15 : i32
    %c0_i32_126 = arith.constant 0 : i32
    %235 = tpu.memref_slice %arg2[%138, %c0_i32_126] : memref<64x128xf32, #tpu.memory_space<any>> -> memref<1x128xf32, #tpu.memory_space<any>>
    %236 = tpu.memref_squeeze %235 : memref<1x128xf32, #tpu.memory_space<any>> -> memref<128xf32, #tpu.memory_space<any>>
    %c0_i32_127 = arith.constant 0 : i32
    %237 = tpu.memref_slice %arg3[%c15_i32_124, %c0_i32_127] : memref<16x128xf32, #tpu.memory_space<vmem>> -> memref<1x128xf32, #tpu.memory_space<vmem>>
    %238 = tpu.memref_squeeze %237 : memref<1x128xf32, #tpu.memory_space<vmem>> -> memref<128xf32, #tpu.memory_space<vmem>>
    %239 = tpu.memref_slice %arg4[%c15_i32_125] : memref<16x!tpu.dma_semaphore, #tpu.memory_space<semaphore_mem>> -> memref<1x!tpu.dma_semaphore, #tpu.memory_space<semaphore_mem>>
    %240 = tpu.memref_squeeze %239 : memref<1x!tpu.dma_semaphore, #tpu.memory_space<semaphore_mem>> -> memref<!tpu.dma_semaphore, #tpu.memory_space<semaphore_mem>>
    tpu.wait_dma2 semaphore(%240 : memref<!tpu.dma_semaphore, #tpu.memory_space<semaphore_mem>>) src(%236 : memref<128xf32, #tpu.memory_space<any>>) dst(%238 : memref<128xf32, #tpu.memory_space<vmem>>)
    return
  }
  func.func @transform_1(%arg0: i32, %arg1: memref<16xi32, #tpu.memory_space<smem>>) -> (i32, i32) {
    %c0_i32 = arith.constant 0 : i32
    %c0_i32_0 = arith.constant 0 : i32
    return %arg0, %c0_i32 : i32, i32
  }
}

</mosaic_0001>

<bundles_post_ra>
// kernel: tpu_custom_call.1
= control target key start
LH: loop header
LB: loop body
LE: loop exit
PB: predicated region body
PF: predicated region fallthrough
CT: control target
= control target key end

     0   :  { %s1323_s0 = inlined_call_operand.hbm [shape: s32[16], index: 0, kind: input, shape index: {}]   ;;  %s1324_s1 = inlined_call_operand.hbm [shape: f32[64,128], index: 1, kind: input, shape index: {}]   ;;  %s1325_s2 = inlined_call_operand.hbm [shape: f32[16,128], index: 2, kind: output, shape index: {}]  }
   0x1   :  { %s539_s11 = scalar_lea.hbm %s1323_s0, 16 }
   0x2   :  { %p540_p0 = scmp.ne.s32.totalorder %s1323_s0, %s539_s11  ;;  %p543_p1 = scmp.lt.u32.totalorder %s539_s11, %s1323_s0 }
   0x4   :  { %p545_p2 = pnand %p543_p1, %p540_p0 }
   0x6   :  { %548 = shalt.err (!%p545_p2)  }
   0x7   :  { %s991_s16 = smov [#allocation4]  }
   0x8   :  { %8 = dma.hbm_to_smem %s1323_s0, 16, %s991_s16, [#allocation3] }
   0x9   :  { %955 = dma.done.wait [#allocation3], 16 }
   0xa   :  { %956 = vsyncadd [#allocation3], 4294967280 }
   0xb   :  { %10 = sfence }
   0xc   :  { %11 = vsyncpa [#allocation6], 0  ;;  %s13_s19 = sld [smem:[#allocation4]]  ;;  %s992_s20 = smov [#allocation5]  }
   0xd   :  { %s23_s21 = sshll.u32 %s992_s20, 4  ;;  %s1037_s22 = sld [smem:[#allocation4 + $0x1]]  ;;  %s1039_s21 = int_to_ptr.vmem [resolvable:$true] %s23_s21 }
   0xe   :  { %s993_s23 = smov [#allocation5 + $0x1]   ;;  %s1041_s25 = sld [smem:[#allocation4 + $0x2]] }
   0xf   :  { %s40_s24 = sshll.u32 %s993_s23, 4  ;;  %s994_s26 = smov [#allocation5 + $0x2]   ;;  %s1043_s24 = int_to_ptr.vmem [resolvable:$true] %s40_s24 }
  0x10   :  { %s57_s0 = sshll.u32 %s994_s26, 4  ;;  %s1045_s27 = sld [smem:[#allocation4 + $0x3]]  ;;  %s1047_s0 = int_to_ptr.vmem [resolvable:$true] %s57_s0 }
  0x11   :  { %s1056_s8 = scalar_lea.hbm %s1324_s1, 1024 }
  0x12   :  { %s473_s28 = sshll.u32 %s13_s19, 4 }
  0x13   :  { %s15_s3 = scalar_lea.hbm %s1324_s1, %s473_s28  ;;  %s475_s4 = sshll.u32 %s1037_s22, 4 }
  0x14   :  { %s549_s5 = scalar_lea.hbm %s15_s3, 16  ;;  %p552_p4 = scmp.lt.u32.totalorder %s15_s3, %s1324_s1 }
  0x15   :  { %p550_p3 = scmp.ne.s32.totalorder %s15_s3, %s549_s5  ;;  %p553_p5 = scmp.lt.u32.totalorder %s1056_s8, %s549_s5 }
  0x16   :  { %p555_p7 = scmp.lt.u32.totalorder %s549_s5, %s15_s3 }
  0x17   :  { %p554_p6 = por %p553_p5, %p552_p4 }
  0x19   :  { %p556_p8 = por %p555_p7, %p554_p6 }
  0x1b   :  { %p557_p9 = pnand %p556_p8, %p550_p3 }
  0x1d   :  { %560 = shalt.err (!%p557_p9)  }
  0x1e   :  { %s561_s11 = scalar_lea.vmem %s1039_s21, 16  ;;  %s1065_s12 = scalar_lea.vmem %s1039_s21, 256 }
  0x1f   :  { %p562_p10 = scmp.ne.s32.totalorder %s1039_s21, %s561_s11  ;;  %p566_p11 = scmp.lt.s32.totalorder %s1039_s21, %s1039_s21 }
  0x20   :  { %p567_p12 = scmp.lt.s32.totalorder %s1065_s12, %s561_s11 }
  0x22   :  { %p568_p13 = por %p567_p12, %p566_p11 }
  0x24   :  { %p569_p0 = pnand %p568_p13, %p562_p10 }
  0x26   :  { %572 = shalt.err (!%p569_p0)  }
  0x27   :  { %26 = dma.hbm_to_vmem [thread:$0]  %s15_s3, 16, %s1039_s21, [#allocation2] }
  0x28   :  { %s30_s15 = scalar_lea.hbm %s1324_s1, %s475_s4  ;;  %s477_s16 = sshll.u32 %s1041_s25, 4 }
  0x29   :  { %s573_s17 = scalar_lea.hbm %s30_s15, 16  ;;  %p576_p2 = scmp.lt.u32.totalorder %s30_s15, %s1324_s1 }
  0x2a   :  { %p574_p1 = scmp.ne.s32.totalorder %s30_s15, %s573_s17  ;;  %p577_p3 = scmp.lt.u32.totalorder %s1056_s8, %s573_s17 }
  0x2b   :  { %p579_p5 = scmp.lt.u32.totalorder %s573_s17, %s30_s15 }
  0x2c   :  { %p578_p4 = por %p577_p3, %p576_p2 }
  0x2e   :  { %p580_p6 = por %p579_p5, %p578_p4 }
  0x30   :  { %p581_p7 = pnand %p580_p6, %p574_p1 }
  0x32   :  { %584 = shalt.err (!%p581_p7)  }
  0x33   :  { %s585_s20 = scalar_lea.vmem %s1043_s24, 16  ;;  %p590_p9 = scmp.lt.s32.totalorder %s1043_s24, %s1039_s21 }
  0x34   :  { %p586_p8 = scmp.ne.s32.totalorder %s1043_s24, %s585_s20  ;;  %p591_p10 = scmp.lt.s32.totalorder %s1065_s12, %s585_s20 }
  0x36   :  { %p592_p12 = por %p591_p10, %p590_p9 }
  0x38   :  { %p593_p13 = pnand %p592_p12, %p586_p8 }
  0x3a   :  { %596 = shalt.err (!%p593_p13)  }
  0x3b   :  { %43 = dma.hbm_to_vmem [thread:$0]  %s30_s15, 16, %s1043_s24, [#allocation2 + $0x1] }
  0x3c   :  { %s47_s25 = scalar_lea.hbm %s1324_s1, %s477_s16  ;;  %s479_s26 = sshll.u32 %s1045_s27, 4 }
  0x3d   :  { %s597_s28 = scalar_lea.hbm %s47_s25, 16  ;;  %p600_p1 = scmp.lt.u32.totalorder %s47_s25, %s1324_s1 }
  0x3e   :  { %p598_p0 = scmp.ne.s32.totalorder %s47_s25, %s597_s28  ;;  %p601_p2 = scmp.lt.u32.totalorder %s1056_s8, %s597_s28 }
  0x3f   :  { %p603_p4 = scmp.lt.u32.totalorder %s597_s28, %s47_s25 }
  0x40   :  { %p602_p3 = por %p601_p2, %p600_p1 }
  0x42   :  { %p604_p5 = por %p603_p4, %p602_p3 }
  0x44   :  { %p605_p6 = pnand %p604_p5, %p598_p0 }
  0x46   :  { %608 = shalt.err (!%p605_p6)  }
  0x47   :  { %s609_s24 = scalar_lea.vmem %s1047_s0, 16  ;;  %p614_p8 = scmp.lt.s32.totalorder %s1047_s0, %s1039_s21 }
  0x48   :  { %p610_p7 = scmp.ne.s32.totalorder %s1047_s0, %s609_s24  ;;  %p615_p9 = scmp.lt.s32.totalorder %s1065_s12, %s609_s24 }
  0x4a   :  { %p616_p10 = por %p615_p9, %p614_p8 }
  0x4c   :  { %p617_p12 = pnand %p616_p10, %p610_p7 }
  0x4e   :  { %620 = shalt.err (!%p617_p12)  }
  0x4f   :  { %60 = dma.hbm_to_vmem [thread:$0]  %s47_s25, 16, %s1047_s0, [#allocation2 + $0x2] }
  0x50   :  { %s64_s4 = scalar_lea.hbm %s1324_s1, %s479_s26  ;;  %s995_s5 = smov [#allocation5 + $0x3]  }
  0x51   :  { %s74_s6 = sshll.u32 %s995_s5, 4  ;;  %s1105_s7 = sld [smem:[#allocation4 + $0x4]]  ;;  %s75_s6 = int_to_ptr.vmem [resolvable:$true] %s74_s6 }
  0x52   :  { %s621_s9 = scalar_lea.hbm %s64_s4, 16  ;;  %p624_p0 = scmp.lt.u32.totalorder %s64_s4, %s1324_s1 }
  0x53   :  { %p622_p13 = scmp.ne.s32.totalorder %s64_s4, %s621_s9  ;;  %p625_p1 = scmp.lt.u32.totalorder %s1056_s8, %s621_s9 }
  0x54   :  { %p627_p3 = scmp.lt.u32.totalorder %s621_s9, %s64_s4 }
  0x55   :  { %p626_p2 = por %p625_p1, %p624_p0 }
  0x57   :  { %p628_p4 = por %p627_p3, %p626_p2 }
  0x59   :  { %p629_p5 = pnand %p628_p4, %p622_p13 }
  0x5b   :  { %632 = shalt.err (!%p629_p5)  }
  0x5c   :  { %s633_s0 = scalar_lea.vmem %s75_s6, 16  ;;  %p638_p7 = scmp.lt.s32.totalorder %s75_s6, %s1039_s21 }
  0x5d   :  { %p634_p6 = scmp.ne.s32.totalorder %s75_s6, %s633_s0  ;;  %p639_p8 = scmp.lt.s32.totalorder %s1065_s12, %s633_s0 }
  0x5f   :  { %p640_p9 = por %p639_p8, %p638_p7 }
  0x61   :  { %p641_p10 = pnand %p640_p9, %p634_p6 }
  0x63   :  { %644 = shalt.err (!%p641_p10)  }
  0x64   :  { %77 = dma.hbm_to_vmem [thread:$0]  %s64_s4, 16, %s75_s6, [#allocation2 + $0x3] }
  0x65   :  { %s996_s13 = smov [#allocation5 + $0x4]   ;;  %s1113_s15 = sld [smem:[#allocation4 + $0x5]] }
  0x66   :  { %s91_s14 = sshll.u32 %s996_s13, 4  ;;  %s997_s16 = smov [#allocation5 + $0x5]   ;;  %s92_s14 = int_to_ptr.vmem [resolvable:$true] %s91_s14 }
  0x67   :  { %s108_s17 = sshll.u32 %s997_s16, 4  ;;  %s1115_s18 = sld [smem:[#allocation4 + $0x6]]  ;;  %s1118_s17 = int_to_ptr.vmem [resolvable:$true] %s108_s17 }
  0x68   :  { %s481_s19 = sshll.u32 %s1105_s7, 4 }
  0x69   :  { %s81_s23 = scalar_lea.hbm %s1324_s1, %s481_s19 }
  0x6a   :  { %s645_s25 = scalar_lea.hbm %s81_s23, 16  ;;  %p648_p13 = scmp.lt.u32.totalorder %s81_s23, %s1324_s1 }
  0x6b   :  { %p646_p12 = scmp.ne.s32.totalorder %s81_s23, %s645_s25  ;;  %p649_p0 = scmp.lt.u32.totalorder %s1056_s8, %s645_s25 }
  0x6c   :  { %p651_p2 = scmp.lt.u32.totalorder %s645_s25, %s81_s23 }
  0x6d   :  { %p650_p1 = por %p649_p0, %p648_p13 }
  0x6f   :  { %p652_p3 = por %p651_p2, %p650_p1 }
  0x71   :  { %p653_p4 = pnand %p652_p3, %p646_p12 }
  0x73   :  { %656 = shalt.err (!%p653_p4)  }
  0x74   :  { %s657_s29 = scalar_lea.vmem %s92_s14, 16  ;;  %p662_p6 = scmp.lt.s32.totalorder %s92_s14, %s1039_s21 }
  0x75   :  { %p658_p5 = scmp.ne.s32.totalorder %s92_s14, %s657_s29  ;;  %p663_p7 = scmp.lt.s32.totalorder %s1065_s12, %s657_s29 }
  0x77   :  { %p664_p8 = por %p663_p7, %p662_p6 }
  0x79   :  { %p665_p9 = pnand %p664_p8, %p658_p5 }
  0x7b   :  { %668 = shalt.err (!%p665_p9)  }
  0x7c   :  { %94 = dma.hbm_to_vmem [thread:$0]  %s81_s23, 16, %s92_s14, [#allocation2 + $0x4] }
  0x7d   :  { %s483_s30 = sshll.u32 %s1113_s15, 4  ;;  %s998_s24 = smov [#allocation5 + $0x6]  }
  0x7e   :  { %s125_s27 = sshll.u32 %s998_s24, 4  ;;  %s98_s5 = scalar_lea.hbm %s1324_s1, %s483_s30  ;;  %s1133_s27 = int_to_ptr.vmem [resolvable:$true] %s125_s27 }
  0x7f   :  { %s669_s6 = scalar_lea.hbm %s98_s5, 16  ;;  %p672_p12 = scmp.lt.u32.totalorder %s98_s5, %s1324_s1 }
  0x80   :  { %p670_p10 = scmp.ne.s32.totalorder %s98_s5, %s669_s6  ;;  %p673_p13 = scmp.lt.u32.totalorder %s1056_s8, %s669_s6 }
  0x81   :  { %p675_p1 = scmp.lt.u32.totalorder %s669_s6, %s98_s5 }
  0x82   :  { %p674_p0 = por %p673_p13, %p672_p12 }
  0x84   :  { %p676_p2 = por %p675_p1, %p674_p0 }
  0x86   :  { %p677_p3 = pnand %p676_p2, %p670_p10 }
  0x88   :  { %680 = shalt.err (!%p677_p3)  }
  0x89   :  { %s681_s10 = scalar_lea.vmem %s1118_s17, 16  ;;  %p686_p5 = scmp.lt.s32.totalorder %s1118_s17, %s1039_s21 }
  0x8a   :  { %p682_p4 = scmp.ne.s32.totalorder %s1118_s17, %s681_s10  ;;  %p687_p6 = scmp.lt.s32.totalorder %s1065_s12, %s681_s10 }
  0x8c   :  { %p688_p7 = por %p687_p6, %p686_p5 }
  0x8e   :  { %p689_p8 = pnand %p688_p7, %p682_p4 }
  0x90   :  { %692 = shalt.err (!%p689_p8)  }
  0x91   :  { %111 = dma.hbm_to_vmem [thread:$0]  %s98_s5, 16, %s1118_s17, [#allocation2 + $0x5] }
  0x92   :  { %s485_s11 = sshll.u32 %s1115_s18, 4  ;;  %s1146_s0 = sld [smem:[#allocation4 + $0x7]] }
  0x93   :  { %s115_s15 = scalar_lea.hbm %s1324_s1, %s485_s11 }
  0x94   :  { %s693_s16 = scalar_lea.hbm %s115_s15, 16  ;;  %p696_p10 = scmp.lt.u32.totalorder %s115_s15, %s1324_s1 }
  0x95   :  { %p694_p9 = scmp.ne.s32.totalorder %s115_s15, %s693_s16  ;;  %p697_p12 = scmp.lt.u32.totalorder %s1056_s8, %s693_s16 }
  0x96   :  { %p699_p0 = scmp.lt.u32.totalorder %s693_s16, %s115_s15 }
  0x97   :  { %p698_p13 = por %p697_p12, %p696_p10 }
  0x99   :  { %p700_p1 = por %p699_p0, %p698_p13 }
  0x9b   :  { %p701_p2 = pnand %p700_p1, %p694_p9 }
  0x9d   :  { %704 = shalt.err (!%p701_p2)  }
  0x9e   :  { %s705_s17 = scalar_lea.vmem %s1133_s27, 16  ;;  %p710_p4 = scmp.lt.s32.totalorder %s1133_s27, %s1039_s21 }
  0x9f   :  { %p706_p3 = scmp.ne.s32.totalorder %s1133_s27, %s705_s17  ;;  %p711_p5 = scmp.lt.s32.totalorder %s1065_s12, %s705_s17 }
  0xa1   :  { %p712_p6 = por %p711_p5, %p710_p4 }
  0xa3   :  { %p713_p7 = pnand %p712_p6, %p706_p3 }
  0xa5   :  { %716 = shalt.err (!%p713_p7)  }
  0xa6   :  { %128 = dma.hbm_to_vmem [thread:$0]  %s115_s15, 16, %s1133_s27, [#allocation2 + $0x6] }
  0xa7   :  { %s999_s18 = smov [#allocation5 + $0x7]   ;;  %s1161_s23 = sld [smem:[#allocation4 + $0x8]] }
  0xa8   :  { %s142_s22 = sshll.u32 %s999_s18, 4  ;;  %s1000_s25 = smov [#allocation5 + $0x8]   ;;  %s143_s22 = int_to_ptr.vmem [resolvable:$true] %s142_s22 }
  0xa9   :  { %s159_s26 = sshll.u32 %s1000_s25, 4  ;;  %s1163_s28 = sld [smem:[#allocation4 + $0x9]]  ;;  %s1166_s26 = int_to_ptr.vmem [resolvable:$true] %s159_s26 }
  0xaa   :  { %s487_s29 = sshll.u32 %s1146_s0, 4 }
  0xab   :  { %s132_s3 = scalar_lea.hbm %s1324_s1, %s487_s29 }
  0xac   :  { %s717_s4 = scalar_lea.hbm %s132_s3, 16  ;;  %p720_p9 = scmp.lt.u32.totalorder %s132_s3, %s1324_s1 }
  0xad   :  { %p718_p8 = scmp.ne.s32.totalorder %s132_s3, %s717_s4  ;;  %p721_p10 = scmp.lt.u32.totalorder %s1056_s8, %s717_s4 }
  0xae   :  { %p723_p13 = scmp.lt.u32.totalorder %s717_s4, %s132_s3 }
  0xaf   :  { %p722_p12 = por %p721_p10, %p720_p9 }
  0xb1   :  { %p724_p0 = por %p723_p13, %p722_p12 }
  0xb3   :  { %p725_p1 = pnand %p724_p0, %p718_p8 }
  0xb5   :  { %728 = shalt.err (!%p725_p1)  }
  0xb6   :  { %s729_s6 = scalar_lea.vmem %s143_s22, 16  ;;  %p734_p3 = scmp.lt.s32.totalorder %s143_s22, %s1039_s21 }
  0xb7   :  { %p730_p2 = scmp.ne.s32.totalorder %s143_s22, %s729_s6  ;;  %p735_p4 = scmp.lt.s32.totalorder %s1065_s12, %s729_s6 }
  0xb9   :  { %p736_p5 = por %p735_p4, %p734_p3 }
  0xbb   :  { %p737_p6 = pnand %p736_p5, %p730_p2 }
  0xbd   :  { %740 = shalt.err (!%p737_p6)  }
  0xbe   :  { %145 = dma.hbm_to_vmem [thread:$0]  %s132_s3, 16, %s143_s22, [#allocation2 + $0x7] }
  0xbf   :  { %s489_s7 = sshll.u32 %s1161_s23, 4  ;;  %s1001_s9 = smov [#allocation5 + $0x9]  }
  0xc0   :  { %s176_s10 = sshll.u32 %s1001_s9, 4  ;;  %s149_s13 = scalar_lea.hbm %s1324_s1, %s489_s7  ;;  %s1181_s10 = int_to_ptr.vmem [resolvable:$true] %s176_s10 }
  0xc1   :  { %s741_s14 = scalar_lea.hbm %s149_s13, 16  ;;  %p744_p8 = scmp.lt.u32.totalorder %s149_s13, %s1324_s1 }
  0xc2   :  { %p742_p7 = scmp.ne.s32.totalorder %s149_s13, %s741_s14  ;;  %p745_p9 = scmp.lt.u32.totalorder %s1056_s8, %s741_s14 }
  0xc3   :  { %p747_p12 = scmp.lt.u32.totalorder %s741_s14, %s149_s13 }
  0xc4   :  { %p746_p10 = por %p745_p9, %p744_p8 }
  0xc6   :  { %p748_p13 = por %p747_p12, %p746_p10 }
  0xc8   :  { %p749_p0 = pnand %p748_p13, %p742_p7 }
  0xca   :  { %752 = shalt.err (!%p749_p0)  }
  0xcb   :  { %s753_s19 = scalar_lea.vmem %s1166_s26, 16  ;;  %p758_p2 = scmp.lt.s32.totalorder %s1166_s26, %s1039_s21 }
  0xcc   :  { %p754_p1 = scmp.ne.s32.totalorder %s1166_s26, %s753_s19  ;;  %p759_p3 = scmp.lt.s32.totalorder %s1065_s12, %s753_s19 }
  0xce   :  { %p760_p4 = por %p759_p3, %p758_p2 }
  0xd0   :  { %p761_p5 = pnand %p760_p4, %p754_p1 }
  0xd2   :  { %764 = shalt.err (!%p761_p5)  }
  0xd3   :  { %162 = dma.hbm_to_vmem [thread:$0]  %s149_s13, 16, %s1166_s26, [#allocation2 + $0x8] }
  0xd4   :  { %s491_s20 = sshll.u32 %s1163_s28, 4  ;;  %s1194_s17 = sld [smem:[#allocation4 + $0xa]] }
  0xd5   :  { %s166_s23 = scalar_lea.hbm %s1324_s1, %s491_s20 }
  0xd6   :  { %s765_s25 = scalar_lea.hbm %s166_s23, 16  ;;  %p768_p7 = scmp.lt.u32.totalorder %s166_s23, %s1324_s1 }
  0xd7   :  { %p766_p6 = scmp.ne.s32.totalorder %s166_s23, %s765_s25  ;;  %p769_p8 = scmp.lt.u32.totalorder %s1056_s8, %s765_s25 }
  0xd8   :  { %p771_p10 = scmp.lt.u32.totalorder %s765_s25, %s166_s23 }
  0xd9   :  { %p770_p9 = por %p769_p8, %p768_p7 }
  0xdb   :  { %p772_p12 = por %p771_p10, %p770_p9 }
  0xdd   :  { %p773_p13 = pnand %p772_p12, %p766_p6 }
  0xdf   :  { %776 = shalt.err (!%p773_p13)  }
  0xe0   :  { %s777_s26 = scalar_lea.vmem %s1181_s10, 16  ;;  %p782_p1 = scmp.lt.s32.totalorder %s1181_s10, %s1039_s21 }
  0xe1   :  { %p778_p0 = scmp.ne.s32.totalorder %s1181_s10, %s777_s26  ;;  %p783_p2 = scmp.lt.s32.totalorder %s1065_s12, %s777_s26 }
  0xe3   :  { %p784_p3 = por %p783_p2, %p782_p1 }
  0xe5   :  { %p785_p4 = pnand %p784_p3, %p778_p0 }
  0xe7   :  { %788 = shalt.err (!%p785_p4)  }
  0xe8   :  { %179 = dma.hbm_to_vmem [thread:$0]  %s166_s23, 16, %s1181_s10, [#allocation2 + $0x9] }
  0xe9   :  { %s1002_s28 = smov [#allocation5 + $0xa]   ;;  %s1209_s3 = sld [smem:[#allocation4 + $0xb]] }
  0xea   :  { %s193_s24 = sshll.u32 %s1002_s28, 4  ;;  %s1003_s4 = smov [#allocation5 + $0xb]   ;;  %s194_s24 = int_to_ptr.vmem [resolvable:$true] %s193_s24 }
  0xeb   :  { %s210_s5 = sshll.u32 %s1003_s4, 4  ;;  %s1211_s27 = sld [smem:[#allocation4 + $0xc]]  ;;  %s1214_s5 = int_to_ptr.vmem [resolvable:$true] %s210_s5 }
  0xec   :  { %s493_s6 = sshll.u32 %s1194_s17, 4 }
  0xed   :  { %s183_s11 = scalar_lea.hbm %s1324_s1, %s493_s6 }
  0xee   :  { %s789_s0 = scalar_lea.hbm %s183_s11, 16  ;;  %p792_p6 = scmp.lt.u32.totalorder %s183_s11, %s1324_s1 }
  0xef   :  { %p790_p5 = scmp.ne.s32.totalorder %s183_s11, %s789_s0  ;;  %p793_p7 = scmp.lt.u32.totalorder %s1056_s8, %s789_s0 }
  0xf0   :  { %p795_p9 = scmp.lt.u32.totalorder %s789_s0, %s183_s11 }
  0xf1   :  { %p794_p8 = por %p793_p7, %p792_p6 }
  0xf3   :  { %p796_p10 = por %p795_p9, %p794_p8 }
  0xf5   :  { %p797_p12 = pnand %p796_p10, %p790_p5 }
  0xf7   :  { %800 = shalt.err (!%p797_p12)  }
  0xf8   :  { %s801_s14 = scalar_lea.vmem %s194_s24, 16  ;;  %p806_p0 = scmp.lt.s32.totalorder %s194_s24, %s1039_s21 }
  0xf9   :  { %p802_p13 = scmp.ne.s32.totalorder %s194_s24, %s801_s14  ;;  %p807_p1 = scmp.lt.s32.totalorder %s1065_s12, %s801_s14 }
  0xfb   :  { %p808_p2 = por %p807_p1, %p806_p0 }
  0xfd   :  { %p809_p3 = pnand %p808_p2, %p802_p13 }
  0xff   :  { %812 = shalt.err (!%p809_p3)  }
 0x100   :  { %196 = dma.hbm_to_vmem [thread:$0]  %s183_s11, 16, %s194_s24, [#allocation2 + $0xa] }
 0x101   :  { %s495_s15 = sshll.u32 %s1209_s3, 4  ;;  %s1004_s16 = smov [#allocation5 + $0xc]  }
 0x102   :  { %s227_s19 = sshll.u32 %s1004_s16, 4  ;;  %s200_s18 = scalar_lea.hbm %s1324_s1, %s495_s15  ;;  %s1229_s19 = int_to_ptr.vmem [resolvable:$true] %s227_s19 }
 0x103   :  { %s813_s22 = scalar_lea.hbm %s200_s18, 16  ;;  %p816_p5 = scmp.lt.u32.totalorder %s200_s18, %s1324_s1 }
 0x104   :  { %p814_p4 = scmp.ne.s32.totalorder %s200_s18, %s813_s22  ;;  %p817_p6 = scmp.lt.u32.totalorder %s1056_s8, %s813_s22 }
 0x105   :  { %p819_p8 = scmp.lt.u32.totalorder %s813_s22, %s200_s18 }
 0x106   :  { %p818_p7 = por %p817_p6, %p816_p5 }
 0x108   :  { %p820_p9 = por %p819_p8, %p818_p7 }
 0x10a   :  { %p821_p10 = pnand %p820_p9, %p814_p4 }
 0x10c   :  { %824 = shalt.err (!%p821_p10)  }
 0x10d   :  { %s825_s29 = scalar_lea.vmem %s1214_s5, 16  ;;  %p830_p13 = scmp.lt.s32.totalorder %s1214_s5, %s1039_s21 }
 0x10e   :  { %p826_p12 = scmp.ne.s32.totalorder %s1214_s5, %s825_s29  ;;  %p831_p0 = scmp.lt.s32.totalorder %s1065_s12, %s825_s29 }
 0x110   :  { %p832_p1 = por %p831_p0, %p830_p13 }
 0x112   :  { %p833_p2 = pnand %p832_p1, %p826_p12 }
 0x114   :  { %836 = shalt.err (!%p833_p2)  }
 0x115   :  { %213 = dma.hbm_to_vmem [thread:$0]  %s200_s18, 16, %s1214_s5, [#allocation2 + $0xb] }
 0x116   :  { %s497_s30 = sshll.u32 %s1211_s27, 4  ;;  %s1242_s26 = sld [smem:[#allocation4 + $0xd]] }
 0x117   :  { %s217_s3 = scalar_lea.hbm %s1324_s1, %s497_s30 }
 0x118   :  { %s837_s4 = scalar_lea.hbm %s217_s3, 16  ;;  %p840_p4 = scmp.lt.u32.totalorder %s217_s3, %s1324_s1 }
 0x119   :  { %p838_p3 = scmp.ne.s32.totalorder %s217_s3, %s837_s4  ;;  %p841_p5 = scmp.lt.u32.totalorder %s1056_s8, %s837_s4 }
 0x11a   :  { %p843_p7 = scmp.lt.u32.totalorder %s837_s4, %s217_s3 }
 0x11b   :  { %p842_p6 = por %p841_p5, %p840_p4 }
 0x11d   :  { %p844_p8 = por %p843_p7, %p842_p6 }
 0x11f   :  { %p845_p9 = pnand %p844_p8, %p838_p3 }
 0x121   :  { %848 = shalt.err (!%p845_p9)  }
 0x122   :  { %s849_s5 = scalar_lea.vmem %s1229_s19, 16  ;;  %p854_p12 = scmp.lt.s32.totalorder %s1229_s19, %s1039_s21 }
 0x123   :  { %p850_p10 = scmp.ne.s32.totalorder %s1229_s19, %s849_s5  ;;  %p855_p13 = scmp.lt.s32.totalorder %s1065_s12, %s849_s5 }
 0x125   :  { %p856_p0 = por %p855_p13, %p854_p12 }
 0x127   :  { %p857_p1 = pnand %p856_p0, %p850_p10 }
 0x129   :  { %860 = shalt.err (!%p857_p1)  }
 0x12a   :  { %230 = dma.hbm_to_vmem [thread:$0]  %s217_s3, 16, %s1229_s19, [#allocation2 + $0xc] }
 0x12b   :  { %s1005_s27 = smov [#allocation5 + $0xd]   ;;  %s1257_s11 = sld [smem:[#allocation4 + $0xe]] }
 0x12c   :  { %s244_s9 = sshll.u32 %s1005_s27, 4  ;;  %s1006_s0 = smov [#allocation5 + $0xe]   ;;  %s245_s9 = int_to_ptr.vmem [resolvable:$true] %s244_s9 }
 0x12d   :  { %s261_s13 = sshll.u32 %s1006_s0, 4  ;;  %s1259_s10 = sld [smem:[#allocation4 + $0xf]]  ;;  %s1262_s13 = int_to_ptr.vmem [resolvable:$true] %s261_s13 }
 0x12e   :  { %s499_s14 = sshll.u32 %s1242_s26, 4 }
 0x12f   :  { %s234_s20 = scalar_lea.hbm %s1324_s1, %s499_s14 }
 0x130   :  { %s861_s17 = scalar_lea.hbm %s234_s20, 16  ;;  %p864_p3 = scmp.lt.u32.totalorder %s234_s20, %s1324_s1 }
 0x131   :  { %p862_p2 = scmp.ne.s32.totalorder %s234_s20, %s861_s17  ;;  %p865_p4 = scmp.lt.u32.totalorder %s1056_s8, %s861_s17 }
 0x132   :  { %p867_p6 = scmp.lt.u32.totalorder %s861_s17, %s234_s20 }
 0x133   :  { %p866_p5 = por %p865_p4, %p864_p3 }
 0x135   :  { %p868_p7 = por %p867_p6, %p866_p5 }
 0x137   :  { %p869_p8 = pnand %p868_p7, %p862_p2 }
 0x139   :  { %872 = shalt.err (!%p869_p8)  }
 0x13a   :  { %s873_s22 = scalar_lea.vmem %s245_s9, 16  ;;  %p878_p10 = scmp.lt.s32.totalorder %s245_s9, %s1039_s21 }
 0x13b   :  { %p874_p9 = scmp.ne.s32.totalorder %s245_s9, %s873_s22  ;;  %p879_p12 = scmp.lt.s32.totalorder %s1065_s12, %s873_s22 }
 0x13d   :  { %p880_p13 = por %p879_p12, %p878_p10 }
 0x13f   :  { %p881_p0 = pnand %p880_p13, %p874_p9 }
 0x141   :  { %884 = shalt.err (!%p881_p0)  }
 0x142   :  { %247 = dma.hbm_to_vmem [thread:$0]  %s234_s20, 16, %s245_s9, [#allocation2 + $0xd] }
 0x143   :  { %s501_s23 = sshll.u32 %s1257_s11, 4  ;;  %s1007_s25 = smov [#allocation5 + $0xf]  }
 0x144   :  { %s278_s29 = sshll.u32 %s1007_s25, 4  ;;  %s251_s28 = scalar_lea.hbm %s1324_s1, %s501_s23  ;;  %s1277_s29 = int_to_ptr.vmem [resolvable:$true] %s278_s29 }
 0x145   :  { %s885_s24 = scalar_lea.hbm %s251_s28, 16  ;;  %p888_p2 = scmp.lt.u32.totalorder %s251_s28, %s1324_s1 }
 0x146   :  { %p886_p1 = scmp.ne.s32.totalorder %s251_s28, %s885_s24  ;;  %p889_p3 = scmp.lt.u32.totalorder %s1056_s8, %s885_s24 }
 0x147   :  { %p891_p5 = scmp.lt.u32.totalorder %s885_s24, %s251_s28 }
 0x148   :  { %p890_p4 = por %p889_p3, %p888_p2 }
 0x14a   :  { %p892_p6 = por %p891_p5, %p890_p4 }
 0x14c   :  { %p893_p7 = pnand %p892_p6, %p886_p1 }
 0x14e   :  { %896 = shalt.err (!%p893_p7)  }
 0x14f   :  { %s897_s6 = scalar_lea.vmem %s1262_s13, 16  ;;  %p902_p9 = scmp.lt.s32.totalorder %s1262_s13, %s1039_s21 }
 0x150   :  { %p898_p8 = scmp.ne.s32.totalorder %s1262_s13, %s897_s6  ;;  %p903_p10 = scmp.lt.s32.totalorder %s1065_s12, %s897_s6 }
 0x152   :  { %p904_p12 = por %p903_p10, %p902_p9 }
 0x154   :  { %p905_p13 = pnand %p904_p12, %p898_p8 }
 0x156   :  { %908 = shalt.err (!%p905_p13)  }
 0x157   :  { %264 = dma.hbm_to_vmem [thread:$0]  %s251_s28, 16, %s1262_s13, [#allocation2 + $0xe] }
 0x158   :  { %s503_s7 = sshll.u32 %s1259_s10, 4 }
 0x159   :  { %s268_s9 = scalar_lea.hbm %s1324_s1, %s503_s7 }
 0x15a   :  { %s909_s11 = scalar_lea.hbm %s268_s9, 16  ;;  %p912_p1 = scmp.lt.u32.totalorder %s268_s9, %s1324_s1 }
 0x15b   :  { %p910_p0 = scmp.ne.s32.totalorder %s268_s9, %s909_s11  ;;  %p913_p2 = scmp.lt.u32.totalorder %s1056_s8, %s909_s11 }
 0x15c   :  { %p915_p4 = scmp.lt.u32.totalorder %s909_s11, %s268_s9 }
 0x15d   :  { %p914_p3 = por %p913_p2, %p912_p1 }
 0x15f   :  { %p916_p5 = por %p915_p4, %p914_p3 }
 0x161   :  { %p917_p6 = pnand %p916_p5, %p910_p0 }
 0x163   :  { %920 = shalt.err (!%p917_p6)  }
 0x164   :  { %s921_s13 = scalar_lea.vmem %s1277_s29, 16  ;;  %p926_p8 = scmp.lt.s32.totalorder %s1277_s29, %s1039_s21 }
 0x165   :  { %p922_p7 = scmp.ne.s32.totalorder %s1277_s29, %s921_s13  ;;  %p927_p9 = scmp.lt.s32.totalorder %s1065_s12, %s921_s13 }
 0x167   :  { %p928_p10 = por %p927_p9, %p926_p8 }
 0x169   :  { %p929_p12 = pnand %p928_p10, %p922_p7 }
 0x16b   :  { %932 = shalt.err (!%p929_p12)  }
 0x16c   :  { %281 = dma.hbm_to_vmem [thread:$0]  %s268_s9, 16, %s1277_s29, [#allocation2 + $0xf] }
 0x16d   :  { %957 = dma.done.wait [#allocation2], 16 }
 0x16e   :  { %958 = vsyncadd [#allocation2], 4294967280 }
 0x16f   :  { %959 = dma.done.wait [#allocation2 + $0x1], 16 }
 0x170   :  { %960 = vsyncadd [#allocation2 + $0x1], 4294967280 }
 0x171   :  { %961 = dma.done.wait [#allocation2 + $0x2], 16 }
 0x172   :  { %962 = vsyncadd [#allocation2 + $0x2], 4294967280 }
 0x173   :  { %963 = dma.done.wait [#allocation2 + $0x3], 16 }
 0x174   :  { %964 = vsyncadd [#allocation2 + $0x3], 4294967280 }
 0x175   :  { %965 = dma.done.wait [#allocation2 + $0x4], 16 }
 0x176   :  { %966 = vsyncadd [#allocation2 + $0x4], 4294967280 }
 0x177   :  { %967 = dma.done.wait [#allocation2 + $0x5], 16 }
 0x178   :  { %968 = vsyncadd [#allocation2 + $0x5], 4294967280 }
 0x179   :  { %969 = dma.done.wait [#allocation2 + $0x6], 16 }
 0x17a   :  { %970 = vsyncadd [#allocation2 + $0x6], 4294967280 }
 0x17b   :  { %971 = dma.done.wait [#allocation2 + $0x7], 16 }
 0x17c   :  { %972 = vsyncadd [#allocation2 + $0x7], 4294967280 }
 0x17d   :  { %973 = dma.done.wait [#allocation2 + $0x8], 16 }
 0x17e   :  { %974 = vsyncadd [#allocation2 + $0x8], 4294967280 }
 0x17f   :  { %975 = dma.done.wait [#allocation2 + $0x9], 16 }
 0x180   :  { %976 = vsyncadd [#allocation2 + $0x9], 4294967280 }
 0x181   :  { %977 = dma.done.wait [#allocation2 + $0xa], 16 }
 0x182   :  { %978 = vsyncadd [#allocation2 + $0xa], 4294967280 }
 0x183   :  { %979 = dma.done.wait [#allocation2 + $0xb], 16 }
 0x184   :  { %980 = vsyncadd [#allocation2 + $0xb], 4294967280 }
 0x185   :  { %981 = dma.done.wait [#allocation2 + $0xc], 16 }
 0x186   :  { %982 = vsyncadd [#allocation2 + $0xc], 4294967280 }
 0x187   :  { %983 = dma.done.wait [#allocation2 + $0xd], 16 }
 0x188   :  { %984 = vsyncadd [#allocation2 + $0xd], 4294967280 }
 0x189   :  { %985 = dma.done.wait [#allocation2 + $0xe], 16 }
 0x18a   :  { %986 = vsyncadd [#allocation2 + $0xe], 4294967280 }
 0x18b   :  { %987 = dma.done.wait [#allocation2 + $0xf], 16 }
 0x18c   :  { %988 = vsyncadd [#allocation2 + $0xf], 4294967280  ;;  %p934_p13 = scmp.ne.s32.totalorder %s1039_s21, %s1065_s12  ;;  %p939_p0 = scmp.lt.s32.totalorder %s1065_s12, %s1065_s12 }
 0x18e   :  { %p940_p1 = por %p939_p0, %p566_p11 }
 0x190   :  { %p941_p2 = pnand %p940_p1, %p934_p13 }
 0x192   :  { %944 = shalt.err (!%p941_p2)
}
 0x193   :  { %s945_s10 = scalar_lea.hbm %s1325_s2, 256 }
 0x194   :  { %p946_p3 = scmp.ne.s32.totalorder %s1325_s2, %s945_s10  ;;  %p949_p4 = scmp.lt.u32.totalorder %s945_s10, %s1325_s2 }
 0x196   :  { %p951_p5 = pnand %p949_p4, %p946_p3 }
 0x198   :  { %954 = shalt.err (!%p951_p5)
}
 0x199   :  { %s1008_s18 = smov 128   ;;  %s1009_s12 = smov 8  }
 0x19a   :  { %325 = dma.vmem_to_hbm [thread:$0]  %s1039_s21, 256, %s1325_s2, [#allocation6], %s1008_s18, %s1008_s18, %s1009_s12  }
 0x19b   :  { %989 = dma.done.wait [#allocation6], 256  }
 0x19c   :  { %990 = vsyncadd [#allocation6], 4294967040 }
 0x19d   :  { %329 = vsyncpa [#allocation6], 1 }
 0x19e   :  { %330 = vsyncmov [#allocation2] }
 0x1a1   :  { %s331_s23 = vpop.sfrf %330 }
 0x1a2   :  { %p504_p11 = scmp.ne.s32.totalorder %s331_s23, 0 }
 0x1a4   :  { %335 = shalt.err (%p504_p11)  }
 0x1a5   :  { %337 = vsyncmov [#allocation2 + $0x1] }
 0x1a8   :  { %s338_s25 = vpop.sfrf %337 }
 0x1a9   :  { %p505_p6 = scmp.ne.s32.totalorder %s338_s25, 0 }
 0x1ab   :  { %342 = shalt.err (%p505_p6)  }
 0x1ac   :  { %344 = vsyncmov [#allocation2 + $0x2] }
 0x1af   :  { %s345_s29 = vpop.sfrf %344 }
 0x1b0   :  { %p506_p7 = scmp.ne.s32.totalorder %s345_s29, 0 }
 0x1b2   :  { %349 = shalt.err (%p506_p7)  }
 0x1b3   :  { %351 = vsyncmov [#allocation2 + $0x3] }
 0x1b6   :  { %s352_s30 = vpop.sfrf %351 }
 0x1b7   :  { %p507_p8 = scmp.ne.s32.totalorder %s352_s30, 0 }
 0x1b9   :  { %356 = shalt.err (%p507_p8)  }
 0x1ba   :  { %358 = vsyncmov [#allocation2 + $0x4] }
 0x1bd   :  { %s359_s2 = vpop.sfrf %358 }
 0x1be   :  { %p508_p9 = scmp.ne.s32.totalorder %s359_s2, 0 }
 0x1c0   :  { %363 = shalt.err (%p508_p9)  }
 0x1c1   :  { %365 = vsyncmov [#allocation2 + $0x5] }
 0x1c4   :  { %s366_s21 = vpop.sfrf %365 }
 0x1c5   :  { %p509_p10 = scmp.ne.s32.totalorder %s366_s21, 0 }
 0x1c7   :  { %370 = shalt.err (%p509_p10)  }
 0x1c8   :  { %372 = vsyncmov [#allocation2 + $0x6] }
 0x1cb   :  { %s373_s26 = vpop.sfrf %372 }
 0x1cc   :  { %p510_p12 = scmp.ne.s32.totalorder %s373_s26, 0 }
 0x1ce   :  { %377 = shalt.err (%p510_p12)  }
 0x1cf   :  { %379 = vsyncmov [#allocation2 + $0x7] }
 0x1d2   :  { %s380_s28 = vpop.sfrf %379 }
 0x1d3   :  { %p511_p13 = scmp.ne.s32.totalorder %s380_s28, 0 }
 0x1d5   :  { %384 = shalt.err (%p511_p13)  }
 0x1d6   :  { %386 = vsyncmov [#allocation2 + $0x8] }
 0x1d9   :  { %s387_s24 = vpop.sfrf %386 }
 0x1da   :  { %p512_p0 = scmp.ne.s32.totalorder %s387_s24, 0 }
 0x1dc   :  { %391 = shalt.err (%p512_p0)  }
 0x1dd   :  { %393 = vsyncmov [#allocation2 + $0x9] }
 0x1e0   :  { %s394_s3 = vpop.sfrf %393 }
 0x1e1   :  { %p513_p1 = scmp.ne.s32.totalorder %s394_s3, 0 }
 0x1e3   :  { %398 = shalt.err (%p513_p1)  }
 0x1e4   :  { %400 = vsyncmov [#allocation2 + $0xa] }
 0x1e7   :  { %s401_s4 = vpop.sfrf %400 }
 0x1e8   :  { %p514_p2 = scmp.ne.s32.totalorder %s401_s4, 0 }
 0x1ea   :  { %405 = shalt.err (%p514_p2)  }
 0x1eb   :  { %407 = vsyncmov [#allocation2 + $0xb] }
 0x1ee   :  { %s408_s6 = vpop.sfrf %407 }
 0x1ef   :  { %p515_p3 = scmp.ne.s32.totalorder %s408_s6, 0 }
 0x1f1   :  { %412 = shalt.err (%p515_p3)  }
 0x1f2   :  { %414 = vsyncmov [#allocation2 + $0xc] }
 0x1f5   :  { %s415_s7 = vpop.sfrf %414 }
 0x1f6   :  { %p516_p4 = scmp.ne.s32.totalorder %s415_s7, 0 }
 0x1f8   :  { %419 = shalt.err (%p516_p4)  }
 0x1f9   :  { %421 = vsyncmov [#allocation2 + $0xd] }
 0x1fc   :  { %s422_s5 = vpop.sfrf %421 }
 0x1fd   :  { %p517_p5 = scmp.ne.s32.totalorder %s422_s5, 0 }
 0x1ff   :  { %426 = shalt.err (%p517_p5)  }
 0x200   :  { %428 = vsyncmov [#allocation2 + $0xe] }
 0x203   :  { %s429_s27 = vpop.sfrf %428 }
 0x204   :  { %p518_p11 = scmp.ne.s32.totalorder %s429_s27, 0 }
 0x206   :  { %433 = shalt.err (%p518_p11)  }
 0x207   :  { %435 = vsyncmov [#allocation2 + $0xf] }
 0x20a   :  { %s436_s9 = vpop.sfrf %435 }
 0x20b   :  { %p519_p6 = scmp.ne.s32.totalorder %s436_s9, 0 }
 0x20d   :  { %440 = shalt.err (%p519_p6)  }

</bundles_post_ra>
